<compile_context>
chip_gen: v7x
topology: tpu7x:2x2x1
jax: 0.10.0
libtpu: 0.0.40
codegen_flags: <defaults>
</compile_context>

<pallas_src>
import functools

import jax
import jax.numpy as jnp
from jax.experimental import pallas as pl
from jax.experimental.pallas import tpu as pltpu


def cross_attn_kernel(tgt_ref, mem_ref, qpos_ref, pos_ref,
                      wq_ref, wk_ref, wv_ref, bq_ref, bk_ref, bv_ref,
                      wo_ref, bo_ref, gamma_ref, beta_ref,
                      out_ref, *attn_refs, nb, L, S, nhead):
    """One batch block of nb elements; rows are packed as n*L + l / n*S + s."""
    attn_ref = attn_refs[0] if attn_refs else None
    E = tgt_ref.shape[1]
    H = nhead
    dh = E // H
    bf16 = jnp.bfloat16
    f32 = jnp.float32

    tgt = tgt_ref[...]                                   # (nb*L, E) f32
    mem = mem_ref[...]                                   # (nb*S, E) f32

    # --- QKV projections: one dense (rows, E) @ (E, E) matmul each ----------
    # bf16 MXU operands / f32 accumulation.  1/sqrt(dh) and bq are pre-scaled
    # by the wrapper, so no per-element score scaling is needed later.
    q_in = (tgt + qpos_ref[...]).astype(bf16)
    k_in = (mem + pos_ref[...]).astype(bf16)
    v_in = mem.astype(bf16)

    q2 = jnp.dot(q_in, wq_ref[...], preferred_element_type=f32) + bq_ref[...]
    k2 = jnp.dot(k_in, wk_ref[...], preferred_element_type=f32) + bk_ref[...]
    v2 = jnp.dot(v_in, wv_ref[...], preferred_element_type=f32) + bv_ref[...]

    # --- Head-major operand layouts (layout prep only, no extra matmuls) ----
    # q: (H, nb*L, dh) from per-head lane slices stacked on a new leading axis.
    q_h = jnp.stack([q2[:, h * dh:(h + 1) * dh] for h in range(H)],
                    axis=0).astype(bf16)                 # (H, nb*L, dh)
    # k, v: one 2-D transpose + tile-aligned sublane split -> (H, dh, nb*S).
    k_t = k2.T.reshape(H, dh, nb * S).astype(bf16)
    v_t = v2.T.reshape(H, dh, nb * S).astype(bf16)

    inv_h = 1.0 / H
    o_rows = []
    attn_rows = []
    for n in range(nb):                                  # static batch unroll
        q_n = q_h[:, n * L:(n + 1) * L, :]               # (H, L, dh)
        k_n = k_t[:, :, n * S:(n + 1) * S]               # (H, dh, S)
        v_n = v_t[:, :, n * S:(n + 1) * S]               # (H, dh, S)

        # Scores (head-batched, inherent K = dh): (H, L, S), f32 accumulation.
        s = jnp.einsum('hld,hds->hls', q_n, k_n, preferred_element_type=f32)

        # Softmax in f32; denominator via the EUP approximate reciprocal.
        s = s - jnp.max(s, axis=-1, keepdims=True)
        p = jnp.exp(s)
        p = p * pl.reciprocal(jnp.sum(p, axis=-1, keepdims=True), approx=True)

        if attn_ref is not None:
            attn_rows.append(p.sum(axis=0) * inv_h)      # (L, S) head average

        # Weighted values directly in transposed (E, L) layout: the head concat
        # is then a free sublane merge (each head's dh rows are contiguous).
        o_t = jnp.einsum('hds,hls->hdl', v_n, p.astype(bf16),
                         preferred_element_type=f32).reshape(E, L)
        o_rows.append(o_t.T)                             # (L, E) head-concat

    o_all = o_rows[0] if nb == 1 else jnp.concatenate(o_rows, axis=0)

    # --- Output projection: single dense matmul with full K = H*dh = E ------
    tgt2 = jnp.dot(o_all.astype(bf16), wo_ref[...],
                   preferred_element_type=f32) + bo_ref[...]     # (nb*L, E)

    # --- Residual + LayerNorm (f32 on the VPU, eps = 1e-5 like PyTorch) -----
    x = tgt + tgt2
    mu = jnp.mean(x, axis=-1, keepdims=True)
    xc = x - mu
    var = jnp.mean(xc * xc, axis=-1, keepdims=True)
    out_ref[...] = (xc * jax.lax.rsqrt(var + 1e-5)
                    * gamma_ref[...] + beta_ref[...])

    if attn_ref is not None:
        attn_ref[...] = (attn_rows[0] if nb == 1
                         else jnp.concatenate(attn_rows, axis=0))


def _tpu_target():
    """Best-effort generation detection -> (num_tensorcores, vmem_budget_bytes)."""
    try:
        kind = jax.devices()[0].device_kind.lower()
    except Exception:
        return 1, 32 << 20
    if "v7" in kind:
        return 2, 24 << 20        # 64 MiB physical VMEM, 2 TensorCores / chip
    return 1, 48 << 20            # v4/v5e/v6e: 128 MiB physical VMEM, 1 TC


def cross_attention_layer(tgt, memory, params, *, nhead,
                          query_pos=None, pos=None, batch_block=None,
                          need_weights=True):
    """Batch-first layout end-to-end: tgt (N, L, E), memory (N, S, E)
    -> (out (N, L, E), avg_attn (N, L, S) or None).
    Math identical to CrossAttentionLayer.forward_post (dropout = 0)."""
    N, L, E = tgt.shape
    S = memory.shape[1]
    assert E % nhead == 0
    dh = E // nhead

    if query_pos is None:
        query_pos = jnp.zeros_like(tgt)
    if pos is None:
        pos = jnp.zeros_like(memory)

    num_cores, vmem_budget = _tpu_target()

    def block_vmem_bytes(nbk):
        # Double-buffered IO blocks + single-buffered intermediates (f32-equiv)
        # including the per-head score/probability tensors and both outputs.
        io = 4 * nbk * (2 * L * E + 2 * S * E + L * E + L * S)
        inter = 4 * nbk * 3 * (L + 2 * S) * E + 4 * 3 * nhead * L * S
        return 2 * io + inter + 4 * 4 * E * E

    if batch_block is None:
        batch_block = N
        if num_cores > 1 and N % num_cores == 0:
            batch_block = N // num_cores          # one block per TensorCore
        # Bound the in-kernel batch unroll; nb*L ~ one MXU tile edge is enough.
        batch_block = max(1, min(batch_block, max(1, 128 // max(L, 1))))
        while batch_block > 1 and block_vmem_bytes(batch_block) > vmem_budget // 3:
            batch_block -= 1
    while N % batch_block:
        batch_block -= 1
    nb = batch_block
    grid_n = N // nb

    f32 = jnp.float32
    bf16 = jnp.bfloat16

    # Row-major 2-D activation slabs (free reshapes: same HBM byte layout).
    tgt2d = tgt.reshape(N * L, E).astype(f32)
    mem2d = memory.reshape(N * S, E).astype(f32)
    qpos2d = query_pos.reshape(N * L, E).astype(f32)
    pos2d = pos.reshape(N * S, E).astype(f32)

    # Lane-dense 2-D weight slabs; fold the 1/sqrt(dh) score scale into Wq/bq.
    scale = 1.0 / (dh ** 0.5)
    wq = (params['wq'] * scale).astype(bf16)
    wk = params['wk'].astype(bf16)
    wv = params['wv'].astype(bf16)
    wo = params['wo'].astype(bf16)
    bq = (params['bq'] * scale).reshape(1, E).astype(f32)
    bk = params['bk'].reshape(1, E).astype(f32)
    bv = params['bv'].reshape(1, E).astype(f32)
    bo = params['bo'].reshape(1, E).astype(f32)
    gamma = params['gamma'].reshape(1, E).astype(f32)
    beta = params['beta'].reshape(1, E).astype(f32)

    row_L = pl.BlockSpec((nb * L, E), lambda b: (b, 0))
    row_S = pl.BlockSpec((nb * S, E), lambda b: (b, 0))

    def rep(shape):
        return pl.BlockSpec(shape, lambda b: (0,) * len(shape))

    out_spec = pl.BlockSpec((nb * L, E), lambda b: (b, 0))
    out_struct = jax.ShapeDtypeStruct((N * L, E), f32)
    if need_weights:
        out_shape = (out_struct, jax.ShapeDtypeStruct((N * L, S), f32))
        out_specs = (out_spec, pl.BlockSpec((nb * L, S), lambda b: (b, 0)))
    else:
        out_shape = out_struct
        out_specs = out_spec

    # Batch axis: parallel; request an explicit TensorCore split only when a
    # multi-TC part is detected and the grid divides evenly.
    if num_cores > 1 and grid_n > 1 and grid_n % num_cores == 0:
        dim_sem = (pltpu.CORE_PARALLEL,)
    else:
        dim_sem = ("parallel",)

    result = pl.pallas_call(
        functools.partial(cross_attn_kernel, nb=nb, L=L, S=S, nhead=nhead),
        out_shape=out_shape,
        grid=(grid_n,),
        in_specs=[row_L, row_S, row_L, row_S,
                  rep((E, E)), rep((E, E)), rep((E, E)),
                  rep((1, E)), rep((1, E)), rep((1, E)),
                  rep((E, E)), rep((1, E)), rep((1, E)), rep((1, E))],
        out_specs=out_specs,
        compiler_params=pltpu.CompilerParams(
            dimension_semantics=dim_sem,
            vmem_limit_bytes=vmem_budget),
    )(tgt2d, mem2d, qpos2d, pos2d, wq, wk, wv, bq, bk, bv, wo, bo, gamma, beta)

    if need_weights:
        out2d, attn2d = result
        return out2d.reshape(N, L, E), attn2d.reshape(N, L, S)
    return result.reshape(N, L, E), None


def init_params(key, d_model):
    """Synthetic init mirroring the module: xavier_uniform for matrices,
    zeros for biases, LayerNorm weight=1 / bias=0."""
    E = d_model
    ks = jax.random.split(key, 4)
    limit = (6.0 / (E + E)) ** 0.5

    def xavier(k):
        return jax.random.uniform(k, (E, E), jnp.float32, -limit, limit)

    zeros = jnp.zeros((E,), jnp.float32)
    return {
        'wq': xavier(ks[0]), 'wk': xavier(ks[1]), 'wv': xavier(ks[2]),
        'wo': xavier(ks[3]),
        'bq': zeros, 'bk': zeros, 'bv': zeros, 'bo': zeros,
        'gamma': jnp.ones((E,), jnp.float32), 'beta': zeros,
    }


def reference(tgt, memory, p, nhead, query_pos, pos):
    """Pure-JAX reference (batch-first) mirroring nn.MultiheadAttention +
    residual + LayerNorm, using the same precision policy as the kernel
    (bf16 MXU operands, f32 accumulation, f32 VPU math)."""
    N, L, E = tgt.shape
    S = memory.shape[1]
    dh = E // nhead
    bf16 = jnp.bfloat16
    f32 = jnp.float32

    q = jnp.einsum('nle,ed->nld', (tgt + query_pos).astype(bf16),
                   p['wq'].astype(bf16), preferred_element_type=f32) + p['bq']
    k = jnp.einsum('nse,ed->nsd', (memory + pos).astype(bf16),
                   p['wk'].astype(bf16), preferred_element_type=f32) + p['bk']
    v = jnp.einsum('nse,ed->nsd', memory.astype(bf16),
                   p['wv'].astype(bf16), preferred_element_type=f32) + p['bv']

    qh = q.reshape(N, L, nhead, dh).transpose(0, 2, 1, 3)
    kh = k.reshape(N, S, nhead, dh).transpose(0, 2, 1, 3)
    vh = v.reshape(N, S, nhead, dh).transpose(0, 2, 1, 3)

    s = jnp.einsum('nhld,nhsd->nhls', qh.astype(bf16), kh.astype(bf16),
                   preferred_element_type=f32) / jnp.sqrt(jnp.float32(dh))
    pw = jax.nn.softmax(s, axis=-1)
    o = jnp.einsum('nhls,nhsd->nhld', pw.astype(bf16), vh.astype(bf16),
                   preferred_element_type=f32)
    o = o.transpose(0, 2, 1, 3).reshape(N, L, E)

    tgt2 = jnp.einsum('nle,ef->nlf', o.astype(bf16), p['wo'].astype(bf16),
                      preferred_element_type=f32) + p['bo']
    x = tgt + tgt2
    mu = x.mean(-1, keepdims=True)
    var = ((x - mu) ** 2).mean(-1, keepdims=True)
    y = (x - mu) / jnp.sqrt(var + 1e-5) * p['gamma'] + p['beta']
    return y, pw.mean(axis=1)


if __name__ == "__main__":
    d_model, nhead = 32, 4
    N, L, S = 2, 8, 16

    key = jax.random.PRNGKey(0)
    k_p, k_t, k_m, k_qp, k_pp = jax.random.split(key, 5)
    params = init_params(k_p, d_model)

    tgt = jax.random.normal(k_t, (N, L, d_model), jnp.float32)
    memory = jax.random.normal(k_m, (N, S, d_model), jnp.float32)
    query_pos = jax.random.normal(k_qp, (N, L, d_model), jnp.float32)
    pos = jax.random.normal(k_pp, (N, S, d_model), jnp.float32)

    out, avg_attn = cross_attention_layer(
        tgt, memory, params, nhead=nhead, query_pos=query_pos, pos=pos)
    jax.block_until_ready((out, avg_attn))

    # Bandwidth-saving path: skip the attention-weights output entirely.
    out_nw, attn_nw = cross_attention_layer(
        tgt, memory, params, nhead=nhead, query_pos=query_pos, pos=pos,
        need_weights=False)
    jax.block_until_ready(out_nw)

    ref_out, ref_attn = reference(tgt, memory, params, nhead, query_pos, pos)
    assert out.shape == (N, L, d_model) and avg_attn.shape == (N, L, S)
    assert attn_nw is None
    # Tolerance covers the approx-reciprocal softmax and the bf16-folded scale;
    # the reference applies the same bf16-operand / f32-accumulate policy.
    assert jnp.allclose(out, ref_out, atol=1e-2, rtol=1e-2)
    assert jnp.allclose(out_nw, ref_out, atol=1e-2, rtol=1e-2)
    assert jnp.allclose(avg_attn, ref_attn, atol=1e-2, rtol=1e-2)

    print("KERNEL_OK")
</pallas_src>

<mosaic_0001>
module attributes {stable_mosaic.version = 11 : i64} {
  func.func @cross_attn_kernel(%arg0: i32, %arg1: memref<16x32xf32, #tpu.memory_space<vmem>>, %arg2: memref<32x32xf32, #tpu.memory_space<vmem>>, %arg3: memref<16x32xf32, #tpu.memory_space<vmem>>, %arg4: memref<32x32xf32, #tpu.memory_space<vmem>>, %arg5: memref<32x32xbf16, #tpu.memory_space<vmem>>, %arg6: memref<32x32xbf16, #tpu.memory_space<vmem>>, %arg7: memref<32x32xbf16, #tpu.memory_space<vmem>>, %arg8: memref<1x32xf32, #tpu.memory_space<vmem>>, %arg9: memref<1x32xf32, #tpu.memory_space<vmem>>, %arg10: memref<1x32xf32, #tpu.memory_space<vmem>>, %arg11: memref<32x32xbf16, #tpu.memory_space<vmem>>, %arg12: memref<1x32xf32, #tpu.memory_space<vmem>>, %arg13: memref<1x32xf32, #tpu.memory_space<vmem>>, %arg14: memref<1x32xf32, #tpu.memory_space<vmem>>, %arg15: memref<16x32xf32, #tpu.memory_space<vmem>>, %arg16: memref<16x16xf32, #tpu.memory_space<vmem>>) attributes {dimension_semantics = [#tpu.dimension_semantics<parallel>], iteration_bounds = array<i64: 1>, scalar_prefetch = 0 : i64, scratch_operands = 0 : i64, tpu.core_type = #tpu.core_type<tc>, window_params = [{transform_indices = @transform_0, window_bounds = array<i64: 16, 32>}, {transform_indices = @transform_1, window_bounds = array<i64: 32, 32>}, {transform_indices = @transform_2, window_bounds = array<i64: 16, 32>}, {transform_indices = @transform_3, window_bounds = array<i64: 32, 32>}, {pipeline_mode = #tpu.pipeline_mode<synchronous>, transform_indices = @transform_4, window_bounds = array<i64: 32, 32>}, {pipeline_mode = #tpu.pipeline_mode<synchronous>, transform_indices = @transform_5, window_bounds = array<i64: 32, 32>}, {pipeline_mode = #tpu.pipeline_mode<synchronous>, transform_indices = @transform_6, window_bounds = array<i64: 32, 32>}, {pipeline_mode = #tpu.pipeline_mode<synchronous>, transform_indices = @transform_7, window_bounds = array<i64: 1, 32>}, {pipeline_mode = #tpu.pipeline_mode<synchronous>, transform_indices = @transform_8, window_bounds = array<i64: 1, 32>}, {pipeline_mode = #tpu.pipeline_mode<synchronous>, transform_indices = @transform_9, window_bounds = array<i64: 1, 32>}, {pipeline_mode = #tpu.pipeline_mode<synchronous>, transform_indices = @transform_10, window_bounds = array<i64: 32, 32>}, {pipeline_mode = #tpu.pipeline_mode<synchronous>, transform_indices = @transform_11, window_bounds = array<i64: 1, 32>}, {pipeline_mode = #tpu.pipeline_mode<synchronous>, transform_indices = @transform_12, window_bounds = array<i64: 1, 32>}, {pipeline_mode = #tpu.pipeline_mode<synchronous>, transform_indices = @transform_13, window_bounds = array<i64: 1, 32>}, {transform_indices = @transform_14, window_bounds = array<i64: 16, 32>}, {transform_indices = @transform_15, window_bounds = array<i64: 16, 16>}]} {
    %c0 = arith.constant 0 : index
    %c0_0 = arith.constant 0 : index
    %0 = vector.load %arg1[%c0, %c0_0] : memref<16x32xf32, #tpu.memory_space<vmem>>, vector<16x32xf32>
    %c0_1 = arith.constant 0 : index
    %c0_2 = arith.constant 0 : index
    %1 = vector.load %arg2[%c0_1, %c0_2] : memref<32x32xf32, #tpu.memory_space<vmem>>, vector<32x32xf32>
    %c0_3 = arith.constant 0 : index
    %c0_4 = arith.constant 0 : index
    %2 = vector.load %arg3[%c0_3, %c0_4] : memref<16x32xf32, #tpu.memory_space<vmem>>, vector<16x32xf32>
    %3 = arith.addf %0, %2 : vector<16x32xf32>
    %4 = arith.truncf %3 : vector<16x32xf32> to vector<16x32xbf16>
    %c0_5 = arith.constant 0 : index
    %c0_6 = arith.constant 0 : index
    %5 = vector.load %arg4[%c0_5, %c0_6] : memref<32x32xf32, #tpu.memory_space<vmem>>, vector<32x32xf32>
    %6 = arith.addf %1, %5 : vector<32x32xf32>
    %7 = arith.truncf %6 : vector<32x32xf32> to vector<32x32xbf16>
    %8 = arith.truncf %1 : vector<32x32xf32> to vector<32x32xbf16>
    %c0_7 = arith.constant 0 : index
    %c0_8 = arith.constant 0 : index
    %9 = vector.load %arg5[%c0_7, %c0_8] : memref<32x32xbf16, #tpu.memory_space<vmem>>, vector<32x32xbf16>
    %cst = arith.constant dense<0.000000e+00> : vector<16x32xf32>
    %10 = tpu.matmul %4, %9, %cst {dimension_numbers = #tpu.dot_dimension_numbers<[1], [0], [0], [1], [0, 0, 1, 1], [], []>} : vector<16x32xbf16>, vector<32x32xbf16>, vector<16x32xf32> -> vector<16x32xf32>
    %c0_9 = arith.constant 0 : index
    %c0_10 = arith.constant 0 : index
    %11 = vector.load %arg8[%c0_9, %c0_10] : memref<1x32xf32, #tpu.memory_space<vmem>>, vector<1x32xf32>
    %12 = vector.broadcast %11 : vector<1x32xf32> to vector<16x32xf32>
    %13 = arith.addf %10, %12 : vector<16x32xf32>
    %c0_11 = arith.constant 0 : index
    %c0_12 = arith.constant 0 : index
    %14 = vector.load %arg6[%c0_11, %c0_12] : memref<32x32xbf16, #tpu.memory_space<vmem>>, vector<32x32xbf16>
    %cst_13 = arith.constant dense<0.000000e+00> : vector<32x32xf32>
    %15 = tpu.matmul %7, %14, %cst_13 {dimension_numbers = #tpu.dot_dimension_numbers<[1], [0], [0], [1], [0, 0, 1, 1], [], []>} : vector<32x32xbf16>, vector<32x32xbf16>, vector<32x32xf32> -> vector<32x32xf32>
    %c0_14 = arith.constant 0 : index
    %c0_15 = arith.constant 0 : index
    %16 = vector.load %arg9[%c0_14, %c0_15] : memref<1x32xf32, #tpu.memory_space<vmem>>, vector<1x32xf32>
    %17 = vector.broadcast %16 : vector<1x32xf32> to vector<32x32xf32>
    %18 = arith.addf %15, %17 : vector<32x32xf32>
    %c0_16 = arith.constant 0 : index
    %c0_17 = arith.constant 0 : index
    %19 = vector.load %arg7[%c0_16, %c0_17] : memref<32x32xbf16, #tpu.memory_space<vmem>>, vector<32x32xbf16>
    %cst_18 = arith.constant dense<0.000000e+00> : vector<32x32xf32>
    %20 = tpu.matmul %8, %19, %cst_18 {dimension_numbers = #tpu.dot_dimension_numbers<[1], [0], [0], [1], [0, 0, 1, 1], [], []>} : vector<32x32xbf16>, vector<32x32xbf16>, vector<32x32xf32> -> vector<32x32xf32>
    %c0_19 = arith.constant 0 : index
    %c0_20 = arith.constant 0 : index
    %21 = vector.load %arg10[%c0_19, %c0_20] : memref<1x32xf32, #tpu.memory_space<vmem>>, vector<1x32xf32>
    %22 = vector.broadcast %21 : vector<1x32xf32> to vector<32x32xf32>
    %23 = arith.addf %20, %22 : vector<32x32xf32>
    %24 = vector.extract_strided_slice %13 {offsets = [0, 0], sizes = [16, 8], strides = [1, 1]} : vector<16x32xf32> to vector<16x8xf32>
    %25 = vector.extract_strided_slice %13 {offsets = [0, 8], sizes = [16, 8], strides = [1, 1]} : vector<16x32xf32> to vector<16x8xf32>
    %26 = vector.extract_strided_slice %13 {offsets = [0, 16], sizes = [16, 8], strides = [1, 1]} : vector<16x32xf32> to vector<16x8xf32>
    %27 = vector.extract_strided_slice %13 {offsets = [0, 24], sizes = [16, 8], strides = [1, 1]} : vector<16x32xf32> to vector<16x8xf32>
    %28 = vector.shape_cast %24 : vector<16x8xf32> to vector<1x16x8xf32>
    %29 = vector.shape_cast %25 : vector<16x8xf32> to vector<1x16x8xf32>
    %30 = vector.shape_cast %26 : vector<16x8xf32> to vector<1x16x8xf32>
    %31 = vector.shape_cast %27 : vector<16x8xf32> to vector<1x16x8xf32>
    %32 = tpu.concatenate %28, %29, %30, %31 in 0 : vector<1x16x8xf32>, vector<1x16x8xf32>, vector<1x16x8xf32>, vector<1x16x8xf32> -> vector<4x16x8xf32>
    %33 = arith.truncf %32 : vector<4x16x8xf32> to vector<4x16x8xbf16>
    %34 = tpu.transpose %18, [1, 0] : vector<32x32xf32> -> vector<32x32xf32>
    %35 = vector.shape_cast %34 : vector<32x32xf32> to vector<4x8x32xf32>
    %36 = arith.truncf %35 : vector<4x8x32xf32> to vector<4x8x32xbf16>
    %37 = tpu.transpose %23, [1, 0] : vector<32x32xf32> -> vector<32x32xf32>
    %38 = vector.shape_cast %37 : vector<32x32xf32> to vector<4x8x32xf32>
    %39 = arith.truncf %38 : vector<4x8x32xf32> to vector<4x8x32xbf16>
    %40 = vector.extract_strided_slice %33 {offsets = [0, 0, 0], sizes = [4, 8, 8], strides = [1, 1, 1]} : vector<4x16x8xbf16> to vector<4x8x8xbf16>
    %41 = vector.extract_strided_slice %36 {offsets = [0, 0, 0], sizes = [4, 8, 16], strides = [1, 1, 1]} : vector<4x8x32xbf16> to vector<4x8x16xbf16>
    %42 = vector.extract_strided_slice %39 {offsets = [0, 0, 0], sizes = [4, 8, 16], strides = [1, 1, 1]} : vector<4x8x32xbf16> to vector<4x8x16xbf16>
    "tpu.trace_start"() <{level = 10 : i32, message = "hld,hds->hls"}> : () -> ()
    %cst_21 = arith.constant dense<0.000000e+00> : vector<4x8x16xf32>
    %43 = tpu.matmul %40, %41, %cst_21 {dimension_numbers = #tpu.dot_dimension_numbers<[2], [1], [1], [2], [0, 0, 0, 1, 1, 2], [0], [0]>} : vector<4x8x8xbf16>, vector<4x8x16xbf16>, vector<4x8x16xf32> -> vector<4x8x16xf32>
    "tpu.trace_stop"() : () -> ()
    %cst_22 = arith.constant dense<0xFF800000> : vector<4x8xf32>
    %44 = vector.multi_reduction <maximumf>, %43, %cst_22 [2] : vector<4x8x16xf32> to vector<4x8xf32>
    %45 = vector.shape_cast %44 : vector<4x8xf32> to vector<4x8x1xf32>
    %46 = vector.broadcast %45 : vector<4x8x1xf32> to vector<4x8x16xf32>
    %47 = arith.subf %43, %46 : vector<4x8x16xf32>
    %48 = math.exp %47 : vector<4x8x16xf32>
    %cst_23 = arith.constant dense<0.000000e+00> : vector<4x8xf32>
    %49 = vector.multi_reduction <add>, %48, %cst_23 [2] : vector<4x8x16xf32> to vector<4x8xf32>
    %50 = vector.shape_cast %49 : vector<4x8xf32> to vector<4x8x1xf32>
    %51 = tpu.reciprocal %50 {approx = true} : vector<4x8x1xf32> -> vector<4x8x1xf32>
    %52 = vector.broadcast %51 : vector<4x8x1xf32> to vector<4x8x16xf32>
    %53 = arith.mulf %48, %52 : vector<4x8x16xf32>
    %cst_24 = arith.constant dense<0.000000e+00> : vector<8x16xf32>
    %54 = vector.multi_reduction <add>, %53, %cst_24 [0] : vector<4x8x16xf32> to vector<8x16xf32>
    %cst_25 = arith.constant 2.500000e-01 : f32
    %55 = vector.broadcast %cst_25 : f32 to vector<8x16xf32>
    %56 = arith.mulf %54, %55 : vector<8x16xf32>
    %57 = arith.truncf %53 : vector<4x8x16xf32> to vector<4x8x16xbf16>
    "tpu.trace_start"() <{level = 10 : i32, message = "hds,hls->hdl"}> : () -> ()
    %cst_26 = arith.constant dense<0.000000e+00> : vector<4x8x8xf32>
    %58 = tpu.matmul %42, %57, %cst_26 {dimension_numbers = #tpu.dot_dimension_numbers<[2], [2], [1], [1], [0, 0, 0, 1, 1, 1], [0], [0]>} : vector<4x8x16xbf16>, vector<4x8x16xbf16>, vector<4x8x8xf32> -> vector<4x8x8xf32>
    "tpu.trace_stop"() : () -> ()
    %59 = vector.shape_cast %58 : vector<4x8x8xf32> to vector<32x8xf32>
    %60 = tpu.transpose %59, [1, 0] : vector<32x8xf32> -> vector<8x32xf32>
    %61 = vector.extract_strided_slice %33 {offsets = [0, 8, 0], sizes = [4, 8, 8], strides = [1, 1, 1]} : vector<4x16x8xbf16> to vector<4x8x8xbf16>
    %62 = vector.extract_strided_slice %36 {offsets = [0, 0, 16], sizes = [4, 8, 16], strides = [1, 1, 1]} : vector<4x8x32xbf16> to vector<4x8x16xbf16>
    %63 = vector.extract_strided_slice %39 {offsets = [0, 0, 16], sizes = [4, 8, 16], strides = [1, 1, 1]} : vector<4x8x32xbf16> to vector<4x8x16xbf16>
    "tpu.trace_start"() <{level = 10 : i32, message = "hld,hds->hls"}> : () -> ()
    %cst_27 = arith.constant dense<0.000000e+00> : vector<4x8x16xf32>
    %64 = tpu.matmul %61, %62, %cst_27 {dimension_numbers = #tpu.dot_dimension_numbers<[2], [1], [1], [2], [0, 0, 0, 1, 1, 2], [0], [0]>} : vector<4x8x8xbf16>, vector<4x8x16xbf16>, vector<4x8x16xf32> -> vector<4x8x16xf32>
    "tpu.trace_stop"() : () -> ()
    %cst_28 = arith.constant dense<0xFF800000> : vector<4x8xf32>
    %65 = vector.multi_reduction <maximumf>, %64, %cst_28 [2] : vector<4x8x16xf32> to vector<4x8xf32>
    %66 = vector.shape_cast %65 : vector<4x8xf32> to vector<4x8x1xf32>
    %67 = vector.broadcast %66 : vector<4x8x1xf32> to vector<4x8x16xf32>
    %68 = arith.subf %64, %67 : vector<4x8x16xf32>
    %69 = math.exp %68 : vector<4x8x16xf32>
    %cst_29 = arith.constant dense<0.000000e+00> : vector<4x8xf32>
    %70 = vector.multi_reduction <add>, %69, %cst_29 [2] : vector<4x8x16xf32> to vector<4x8xf32>
    %71 = vector.shape_cast %70 : vector<4x8xf32> to vector<4x8x1xf32>
    %72 = tpu.reciprocal %71 {approx = true} : vector<4x8x1xf32> -> vector<4x8x1xf32>
    %73 = vector.broadcast %72 : vector<4x8x1xf32> to vector<4x8x16xf32>
    %74 = arith.mulf %69, %73 : vector<4x8x16xf32>
    %cst_30 = arith.constant dense<0.000000e+00> : vector<8x16xf32>
    %75 = vector.multi_reduction <add>, %74, %cst_30 [0] : vector<4x8x16xf32> to vector<8x16xf32>
    %cst_31 = arith.constant 2.500000e-01 : f32
    %76 = vector.broadcast %cst_31 : f32 to vector<8x16xf32>
    %77 = arith.mulf %75, %76 : vector<8x16xf32>
    %78 = arith.truncf %74 : vector<4x8x16xf32> to vector<4x8x16xbf16>
    "tpu.trace_start"() <{level = 10 : i32, message = "hds,hls->hdl"}> : () -> ()
    %cst_32 = arith.constant dense<0.000000e+00> : vector<4x8x8xf32>
    %79 = tpu.matmul %63, %78, %cst_32 {dimension_numbers = #tpu.dot_dimension_numbers<[2], [2], [1], [1], [0, 0, 0, 1, 1, 1], [0], [0]>} : vector<4x8x16xbf16>, vector<4x8x16xbf16>, vector<4x8x8xf32> -> vector<4x8x8xf32>
    "tpu.trace_stop"() : () -> ()
    %80 = vector.shape_cast %79 : vector<4x8x8xf32> to vector<32x8xf32>
    %81 = tpu.transpose %80, [1, 0] : vector<32x8xf32> -> vector<8x32xf32>
    %82 = tpu.concatenate %60, %81 in 0 : vector<8x32xf32>, vector<8x32xf32> -> vector<16x32xf32>
    %83 = arith.truncf %82 : vector<16x32xf32> to vector<16x32xbf16>
    %c0_33 = arith.constant 0 : index
    %c0_34 = arith.constant 0 : index
    %84 = vector.load %arg11[%c0_33, %c0_34] : memref<32x32xbf16, #tpu.memory_space<vmem>>, vector<32x32xbf16>
    %cst_35 = arith.constant dense<0.000000e+00> : vector<16x32xf32>
    %85 = tpu.matmul %83, %84, %cst_35 {dimension_numbers = #tpu.dot_dimension_numbers<[1], [0], [0], [1], [0, 0, 1, 1], [], []>} : vector<16x32xbf16>, vector<32x32xbf16>, vector<16x32xf32> -> vector<16x32xf32>
    %c0_36 = arith.constant 0 : index
    %c0_37 = arith.constant 0 : index
    %86 = vector.load %arg12[%c0_36, %c0_37] : memref<1x32xf32, #tpu.memory_space<vmem>>, vector<1x32xf32>
    %87 = vector.broadcast %86 : vector<1x32xf32> to vector<16x32xf32>
    %88 = arith.addf %85, %87 : vector<16x32xf32>
    %89 = arith.addf %0, %88 : vector<16x32xf32>
    %cst_38 = arith.constant dense<0.000000e+00> : vector<16xf32>
    %90 = vector.multi_reduction <add>, %89, %cst_38 [1] : vector<16x32xf32> to vector<16xf32>
    %91 = vector.shape_cast %90 : vector<16xf32> to vector<16x1xf32>
    %cst_39 = arith.constant 3.200000e+01 : f32
    %92 = vector.broadcast %cst_39 : f32 to vector<16x1xf32>
    %93 = arith.divf %91, %92 : vector<16x1xf32>
    %94 = vector.broadcast %93 : vector<16x1xf32> to vector<16x32xf32>
    %95 = arith.subf %89, %94 : vector<16x32xf32>
    %96 = arith.mulf %95, %95 : vector<16x32xf32>
    %cst_40 = arith.constant dense<0.000000e+00> : vector<16xf32>
    %97 = vector.multi_reduction <add>, %96, %cst_40 [1] : vector<16x32xf32> to vector<16xf32>
    %98 = vector.shape_cast %97 : vector<16xf32> to vector<16x1xf32>
    %cst_41 = arith.constant 3.200000e+01 : f32
    %99 = vector.broadcast %cst_41 : f32 to vector<16x1xf32>
    %100 = arith.divf %98, %99 : vector<16x1xf32>
    %cst_42 = arith.constant 9.99999974E-6 : f32
    %101 = vector.broadcast %cst_42 : f32 to vector<16x1xf32>
    %102 = arith.addf %100, %101 : vector<16x1xf32>
    %103 = math.rsqrt %102 : vector<16x1xf32>
    %104 = vector.broadcast %103 : vector<16x1xf32> to vector<16x32xf32>
    %105 = arith.mulf %95, %104 : vector<16x32xf32>
    %c0_43 = arith.constant 0 : index
    %c0_44 = arith.constant 0 : index
    %106 = vector.load %arg13[%c0_43, %c0_44] : memref<1x32xf32, #tpu.memory_space<vmem>>, vector<1x32xf32>
    %107 = vector.broadcast %106 : vector<1x32xf32> to vector<16x32xf32>
    %108 = arith.mulf %105, %107 : vector<16x32xf32>
    %c0_45 = arith.constant 0 : index
    %c0_46 = arith.constant 0 : index
    %109 = vector.load %arg14[%c0_45, %c0_46] : memref<1x32xf32, #tpu.memory_space<vmem>>, vector<1x32xf32>
    %110 = vector.broadcast %109 : vector<1x32xf32> to vector<16x32xf32>
    %111 = arith.addf %108, %110 : vector<16x32xf32>
    %c0_47 = arith.constant 0 : index
    %c0_48 = arith.constant 0 : index
    %112 = vector.load %arg15[%c0_47, %c0_48] : memref<16x32xf32, #tpu.memory_space<vmem>>, vector<16x32xf32>
    tpu.vector_store %arg15[%c0_47, %c0_48], %111 {strides = array<i32>} : memref<16x32xf32, #tpu.memory_space<vmem>>, vector<16x32xf32>,
    %113 = tpu.concatenate %56, %77 in 0 : vector<8x16xf32>, vector<8x16xf32> -> vector<16x16xf32>
    %c0_49 = arith.constant 0 : index
    %c0_50 = arith.constant 0 : index
    %114 = vector.load %arg16[%c0_49, %c0_50] : memref<16x16xf32, #tpu.memory_space<vmem>>, vector<16x16xf32>
    tpu.vector_store %arg16[%c0_49, %c0_50], %113 {strides = array<i32>} : memref<16x16xf32, #tpu.memory_space<vmem>>, vector<16x16xf32>,
    return
  }
  func.func @transform_0(%arg0: i32) -> (i32, i32) {
    %c0_i32 = arith.constant 0 : i32
    %c0_i32_0 = arith.constant 0 : i32
    return %arg0, %c0_i32 : i32, i32
  }
  func.func @transform_1(%arg0: i32) -> (i32, i32) {
    %c0_i32 = arith.constant 0 : i32
    %c0_i32_0 = arith.constant 0 : i32
    return %arg0, %c0_i32 : i32, i32
  }
  func.func @transform_2(%arg0: i32) -> (i32, i32) {
    %c0_i32 = arith.constant 0 : i32
    %c0_i32_0 = arith.constant 0 : i32
    return %arg0, %c0_i32 : i32, i32
  }
  func.func @transform_3(%arg0: i32) -> (i32, i32) {
    %c0_i32 = arith.constant 0 : i32
    %c0_i32_0 = arith.constant 0 : i32
    return %arg0, %c0_i32 : i32, i32
  }
  func.func @transform_4(%arg0: i32) -> (i32, i32) {
    %c0_i32 = arith.constant 0 : i32
    %c0_i32_0 = arith.constant 0 : i32
    %c0_i32_1 = arith.constant 0 : i32
    return %c0_i32, %c0_i32_0 : i32, i32
  }
  func.func @transform_5(%arg0: i32) -> (i32, i32) {
    %c0_i32 = arith.constant 0 : i32
    %c0_i32_0 = arith.constant 0 : i32
    %c0_i32_1 = arith.constant 0 : i32
    return %c0_i32, %c0_i32_0 : i32, i32
  }
  func.func @transform_6(%arg0: i32) -> (i32, i32) {
    %c0_i32 = arith.constant 0 : i32
    %c0_i32_0 = arith.constant 0 : i32
    %c0_i32_1 = arith.constant 0 : i32
    return %c0_i32, %c0_i32_0 : i32, i32
  }
  func.func @transform_7(%arg0: i32) -> (i32, i32) {
    %c0_i32 = arith.constant 0 : i32
    %c0_i32_0 = arith.constant 0 : i32
    %c0_i32_1 = arith.constant 0 : i32
    return %c0_i32, %c0_i32_0 : i32, i32
  }
  func.func @transform_8(%arg0: i32) -> (i32, i32) {
    %c0_i32 = arith.constant 0 : i32
    %c0_i32_0 = arith.constant 0 : i32
    %c0_i32_1 = arith.constant 0 : i32
    return %c0_i32, %c0_i32_0 : i32, i32
  }
  func.func @transform_9(%arg0: i32) -> (i32, i32) {
    %c0_i32 = arith.constant 0 : i32
    %c0_i32_0 = arith.constant 0 : i32
    %c0_i32_1 = arith.constant 0 : i32
    return %c0_i32, %c0_i32_0 : i32, i32
  }
  func.func @transform_10(%arg0: i32) -> (i32, i32) {
    %c0_i32 = arith.constant 0 : i32
    %c0_i32_0 = arith.constant 0 : i32
    %c0_i32_1 = arith.constant 0 : i32
    return %c0_i32, %c0_i32_0 : i32, i32
  }
  func.func @transform_11(%arg0: i32) -> (i32, i32) {
    %c0_i32 = arith.constant 0 : i32
    %c0_i32_0 = arith.constant 0 : i32
    %c0_i32_1 = arith.constant 0 : i32
    return %c0_i32, %c0_i32_0 : i32, i32
  }
  func.func @transform_12(%arg0: i32) -> (i32, i32) {
    %c0_i32 = arith.constant 0 : i32
    %c0_i32_0 = arith.constant 0 : i32
    %c0_i32_1 = arith.constant 0 : i32
    return %c0_i32, %c0_i32_0 : i32, i32
  }
  func.func @transform_13(%arg0: i32) -> (i32, i32) {
    %c0_i32 = arith.constant 0 : i32
    %c0_i32_0 = arith.constant 0 : i32
    %c0_i32_1 = arith.constant 0 : i32
    return %c0_i32, %c0_i32_0 : i32, i32
  }
  func.func @transform_14(%arg0: i32) -> (i32, i32) {
    %c0_i32 = arith.constant 0 : i32
    %c0_i32_0 = arith.constant 0 : i32
    return %arg0, %c0_i32 : i32, i32
  }
  func.func @transform_15(%arg0: i32) -> (i32, i32) {
    %c0_i32 = arith.constant 0 : i32
    %c0_i32_0 = arith.constant 0 : i32
    return %arg0, %c0_i32 : i32, i32
  }
}

</mosaic_0001>

<bundles_post_ra>
// kernel: tpu_custom_call.1
= control target key start
LH: loop header
LB: loop body
LE: loop exit
PB: predicated region body
PF: predicated region fallthrough
CT: control target
= control target key end

     0   :  { %21 = vsyncpa [#allocation3], 0  ;;  %s2583_s0 = inlined_call_operand.hbm [shape: f32[16,32], index: 0, kind: input, shape index: {}]   ;;  %s2584_s1 = inlined_call_operand.hbm [shape: f32[32,32], index: 1, kind: input, shape index: {}]   ;;  %s2585_s2 = inlined_call_operand.hbm [shape: f32[16,32], index: 2, kind: input, shape index: {}]   ;;  %s2586_s3 = inlined_call_operand.hbm [shape: f32[32,32], index: 3, kind: input, shape index: {}]   ;;  %s2587_s4 = inlined_call_operand.hbm [shape: bf16[32,32], index: 4, kind: input, shape index: {}]   ;;  %s2588_s5 = inlined_call_operand.vmem [shape: bf16[32,32], index: 5, kind: input, shape index: {}]   ;;  %s2589_s6 = inlined_call_operand.hbm [shape: bf16[32,32], index: 6, kind: input, shape index: {}]   ;;  %s2590_s7 = inlined_call_operand.vmem [shape: f32[1,32], index: 7, kind: input, shape index: {}]   ;;  %s2591_s8 = inlined_call_operand.vmem [shape: f32[1,32], index: 8, kind: input, shape index: {}]   ;;  %s2592_s9 = inlined_call_operand.hbm [shape: f32[1,32], index: 9, kind: input, shape index: {}]   ;;  %s2593_s10 = inlined_call_operand.vmem [shape: bf16[32,32], index: 10, kind: input, shape index: {}]   ;;  %s2594_s11 = inlined_call_operand.vmem [shape: f32[1,32], index: 11, kind: input, shape index: {}]   ;;  %s2595_s12 = inlined_call_operand.vmem [shape: f32[1,32], index: 12, kind: input, shape index: {}]   ;;  %s2596_s13 = inlined_call_operand.vmem [shape: f32[1,32], index: 13, kind: input, shape index: {}]   ;;  %s2597_s14 = inlined_call_operand.hbm [shape: f32[16,32], index: 14, kind: output, shape index: {0}]   ;;  %s2598_s15 = inlined_call_operand.hbm [shape: f32[16,16], index: 15, kind: output, shape index: {1}]  }
   0x1   :  { %22 = vsyncpa [#allocation6], 0 }
   0x2   :  { %23 = vsyncpa [#allocation9], 0 }
   0x3   :  { %24 = vsyncpa [#allocation12], 0 }
   0x4   :  { %25 = vsyncpa [#allocation4], 0 }
   0x5   :  { %26 = vsyncpa [#allocation16], 0  ;;  %s2100_s18 = smov [#allocation5]   ;;  %s2101_s20 = smov [#allocation8]  }
   0x6   :  { %s44_s19 = sshll.u32 %s2100_s18, 4  ;;  %s68_s21 = sshll.u32 %s2101_s20, 4  ;;  %s45_s19 = int_to_ptr.vmem [resolvable:$true] %s44_s19  ;;  %s2198_s21 = int_to_ptr.vmem [resolvable:$true] %s68_s21 }
   0x7   :  { %s1890_s24 = scalar_lea.hbm %s2584_s1, 512 }
   0x8   :  { %p1891_p0 = scmp.ne.s32.totalorder %s2584_s1, %s1890_s24  ;;  %p1894_p1 = scmp.lt.u32.totalorder %s1890_s24, %s2584_s1 }
   0xa   :  { %p1896_p2 = pnand %p1894_p1, %p1891_p0 }
   0xc   :  { %1899 = shalt.err (!%p1896_p2)
}
   0xd   :  { %s1900_s29 = scalar_lea.vmem %s45_s19, 512  ;;  %p1905_p4 = scmp.lt.s32.totalorder %s45_s19, %s45_s19 }
   0xe   :  { %p1901_p3 = scmp.ne.s32.totalorder %s45_s19, %s1900_s29  ;;  %p1906_p5 = scmp.lt.s32.totalorder %s1900_s29, %s1900_s29 }
  0x10   :  { %p1907_p6 = por %p1906_p5, %p1905_p4 }
  0x12   :  { %p1908_p7 = pnand %p1907_p6, %p1901_p3 }
  0x14   :  { %1911 = shalt.err (!%p1908_p7)
}
  0x15   :  { %s2102_s30 = smov 128   ;;  %s2103_s16 = smov 8  }
  0x16   :  { %50 = dma.hbm_to_vmem [thread:$0]  %s2584_s1, 512, %s45_s19, [#allocation6], %s2102_s30, %s2102_s30, %s2103_s16  }
  0x17   :  { %s1912_s23 = scalar_lea.hbm %s2586_s3, 512 }
  0x18   :  { %p1913_p8 = scmp.ne.s32.totalorder %s2586_s3, %s1912_s23  ;;  %p1916_p9 = scmp.lt.u32.totalorder %s1912_s23, %s2586_s3 }
  0x1a   :  { %p1918_p10 = pnand %p1916_p9, %p1913_p8 }
  0x1c   :  { %1921 = shalt.err (!%p1918_p10)
}
  0x1d   :  { %s1922_s28 = scalar_lea.vmem %s2198_s21, 512  ;;  %p1927_p12 = scmp.lt.s32.totalorder %s2198_s21, %s2198_s21 }
  0x1e   :  { %p1923_p11 = scmp.ne.s32.totalorder %s2198_s21, %s1922_s28  ;;  %p1928_p13 = scmp.lt.s32.totalorder %s1922_s28, %s1922_s28 }
  0x20   :  { %p1929_p0 = por %p1928_p13, %p1927_p12 }
  0x22   :  { %p1930_p1 = pnand %p1929_p0, %p1923_p11 }
  0x24   :  { %1933 = shalt.err (!%p1930_p1)
}
  0x25   :  { %74 = dma.hbm_to_vmem [thread:$0]  %s2586_s3, 512, %s2198_s21, [#allocation9], %s2102_s30, %s2102_s30, %s2103_s16  }
  0x26   :  { %s2104_s29 = smov [#allocation11]   ;;  %s2105_s18 = smov [#allocation2]  }
  0x27   :  { %s94_s17 = sshll.u32 %s2104_s29, 4  ;;  %s32_s20 = sshll.u32 %s2105_s18, 4  ;;  %s95_s17 = int_to_ptr.vmem [resolvable:$true] %s94_s17  ;;  %s2235_s20 = int_to_ptr.vmem [resolvable:$true] %s32_s20 }
  0x28   :  { %s1934_s24 = scalar_lea.hbm %s2589_s6, 256 }
  0x29   :  { %p1935_p2 = scmp.ne.s32.totalorder %s2589_s6, %s1934_s24  ;;  %p1938_p3 = scmp.lt.u32.totalorder %s1934_s24, %s2589_s6 }
  0x2b   :  { %p1940_p4 = pnand %p1938_p3, %p1935_p2 }
  0x2d   :  { %1943 = shalt.err (!%p1940_p4)
}
  0x2e   :  { %s1944_s3 = scalar_lea.vmem %s95_s17, 256  ;;  %p1949_p6 = scmp.lt.s32.totalorder %s95_s17, %s95_s17 }
  0x2f   :  { %p1945_p5 = scmp.ne.s32.totalorder %s95_s17, %s1944_s3  ;;  %p1950_p7 = scmp.lt.s32.totalorder %s1944_s3, %s1944_s3 }
  0x31   :  { %p1951_p8 = por %p1950_p7, %p1949_p6 }
  0x33   :  { %p1952_p9 = pnand %p1951_p8, %p1945_p5 }
  0x35   :  { %1955 = shalt.err (!%p1952_p9)
}
  0x36   :  { %s2106_s21 = smov 64   ;;  %s2107_s1 = smov 4  }
  0x37   :  { %100 = dma.hbm_to_vmem [thread:$0]  %s2589_s6, 256, %s95_s17, [#allocation12], %s2106_s21, %s2106_s21, %s2107_s1  }
  0x38   :  { %s1956_s23 = scalar_lea.hbm %s2583_s0, 256 }
  0x39   :  { %p1957_p10 = scmp.ne.s32.totalorder %s2583_s0, %s1956_s23  ;;  %p1960_p11 = scmp.lt.u32.totalorder %s1956_s23, %s2583_s0 }
  0x3b   :  { %p1962_p12 = pnand %p1960_p11, %p1957_p10 }
  0x3d   :  { %1965 = shalt.err (!%p1962_p12)
}
  0x3e   :  { %s1966_s28 = scalar_lea.vmem %s2235_s20, 256  ;;  %p1971_p0 = scmp.lt.s32.totalorder %s2235_s20, %s2235_s20 }
  0x3f   :  { %p1967_p13 = scmp.ne.s32.totalorder %s2235_s20, %s1966_s28  ;;  %p1972_p1 = scmp.lt.s32.totalorder %s1966_s28, %s1966_s28 }
  0x41   :  { %p1973_p2 = por %p1972_p1, %p1971_p0 }
  0x43   :  { %p1974_p3 = pnand %p1973_p2, %p1967_p13 }
  0x45   :  { %1977 = shalt.err (!%p1974_p3)
}
  0x46   :  { %38 = dma.hbm_to_vmem [thread:$0]  %s2583_s0, 256, %s2235_s20, [#allocation3], %s2102_s30, %s2102_s30, %s2103_s16  }
  0x47   :  { %s2108_s3 = smov [#allocation7]   ;;  %s2109_s29 = smov [#allocation10]  }
  0x48   :  { %s56_s19 = sshll.u32 %s2108_s3, 4  ;;  %s80_s18 = sshll.u32 %s2109_s29, 4  ;;  %s57_s19 = int_to_ptr.vmem [resolvable:$true] %s56_s19  ;;  %s2272_s18 = int_to_ptr.vmem [resolvable:$true] %s80_s18 }
  0x49   :  { %s1978_s24 = scalar_lea.hbm %s2585_s2, 256 }
  0x4a   :  { %p1979_p4 = scmp.ne.s32.totalorder %s2585_s2, %s1978_s24  ;;  %p1982_p5 = scmp.lt.u32.totalorder %s1978_s24, %s2585_s2 }
  0x4c   :  { %p1984_p6 = pnand %p1982_p5, %p1979_p4 }
  0x4e   :  { %1987 = shalt.err (!%p1984_p6)
}
  0x4f   :  { %s1988_s0 = scalar_lea.vmem %s57_s19, 256  ;;  %p1993_p8 = scmp.lt.s32.totalorder %s57_s19, %s57_s19 }
  0x50   :  { %p1989_p7 = scmp.ne.s32.totalorder %s57_s19, %s1988_s0  ;;  %p1994_p9 = scmp.lt.s32.totalorder %s1988_s0, %s1988_s0 }
  0x52   :  { %p1995_p10 = por %p1994_p9, %p1993_p8 }
  0x54   :  { %p1996_p11 = pnand %p1995_p10, %p1989_p7 }
  0x56   :  { %1999 = shalt.err (!%p1996_p11)
}
  0x57   :  { %62 = dma.hbm_to_vmem [thread:$0]  %s2585_s2, 256, %s57_s19, [#allocation6], %s2102_s30, %s2102_s30, %s2103_s16  }
  0x58   :  { %s2000_s29 = scalar_lea.hbm %s2587_s4, 256 }
  0x59   :  { %p2001_p12 = scmp.ne.s32.totalorder %s2587_s4, %s2000_s29  ;;  %p2004_p13 = scmp.lt.u32.totalorder %s2000_s29, %s2587_s4 }
  0x5b   :  { %p2006_p0 = pnand %p2004_p13, %p2001_p12 }
  0x5d   :  { %2009 = shalt.err (!%p2006_p0)
}
  0x5e   :  { %s2010_s26 = scalar_lea.vmem %s2272_s18, 256  ;;  %p2015_p2 = scmp.lt.s32.totalorder %s2272_s18, %s2272_s18 }
  0x5f   :  { %p2011_p1 = scmp.ne.s32.totalorder %s2272_s18, %s2010_s26  ;;  %p2016_p3 = scmp.lt.s32.totalorder %s2010_s26, %s2010_s26 }
  0x61   :  { %p2017_p4 = por %p2016_p3, %p2015_p2 }
  0x63   :  { %p2018_p5 = pnand %p2017_p4, %p2011_p1 }
  0x65   :  { %2021 = shalt.err (!%p2018_p5)
}
  0x66   :  { %86 = dma.hbm_to_vmem [thread:$0]  %s2587_s4, 256, %s2272_s18, [#allocation9], %s2106_s21, %s2106_s21, %s2107_s1  }
  0x67   :  { %s2110_s27 = smov [#allocation13]   ;;  %s2022_s6 = scalar_lea.hbm %s2592_s9, 16 }
  0x68   :  { %s111_s28 = sshll.u32 %s2110_s27, 4  ;;  %p2023_p6 = scmp.ne.s32.totalorder %s2592_s9, %s2022_s6  ;;  %s112_s28 = int_to_ptr.vmem [resolvable:$true] %s111_s28 }
  0x69   :  { %p2026_p7 = scmp.lt.u32.totalorder %s2022_s6, %s2592_s9 }
  0x6b   :  { %p2028_p8 = pnand %p2026_p7, %p2023_p6 }
  0x6d   :  { %2031 = shalt.err (!%p2028_p8)
}
  0x6e   :  { %s2032_s23 = scalar_lea.vmem %s112_s28, 16  ;;  %s2036_s4 = scalar_lea.vmem %s112_s28, 32 }
  0x6f   :  { %p2033_p9 = scmp.ne.s32.totalorder %s112_s28, %s2032_s23  ;;  %p2037_p10 = scmp.lt.s32.totalorder %s112_s28, %s112_s28 }
  0x70   :  { %p2038_p11 = scmp.lt.s32.totalorder %s2036_s4, %s2032_s23 }
  0x72   :  { %p2039_p12 = por %p2038_p11, %p2037_p10 }
  0x74   :  { %p2040_p13 = pnand %p2039_p12, %p2033_p9 }
  0x76   :  { %2043 = shalt.err (!%p2040_p13)
}
  0x77   :  { %114 = dma.hbm_to_vmem [thread:$0]  %s2592_s9, 16, %s112_s28, [#allocation12]  }
  0x78   :  { %2088 = dma.done.wait [#allocation3], 256  }
  0x79   :  { %2089 = vsyncadd [#allocation3], 4294967040 }
  0x7a   :  { %2090 = dma.done.wait [#allocation6], 768  }
  0x7b   :  { %2091 = vsyncadd [#allocation6], 4294966528 }
  0x7c   :  { %2092 = dma.done.wait [#allocation9], 768  }
  0x7d   :  { %2093 = vsyncadd [#allocation9], 4294966528 }
  0x7e   :  { %2094 = dma.done.wait [#allocation12], 272  }
  0x7f   :  { %2095 = vsyncadd [#allocation12], 4294967024  ;;  %v2111_v0 = vmov 0.0   ;;  %vm2112_vm0 = vmmov 0   ;;  %v1846_v1 = vld [vmem:[#allocation10] sm:$0xff]   ;;  %v1847_v2 = vld [vmem:[#allocation10 + $0x8] sm:$0xff]  }
  0x80   :  { %1672 = vmatprep.subr.bf16.mxu0 %v2111_v0  ;;  %1676 = vmatprep.mubr.msk.bf16.mxu0 %vm2112_vm0, %v2111_v0  ;;  %v2324_v3 = vld [vmem:[#allocation2] sm:$0xff]  ;;  %v2326_v4 = vld [vmem:[#allocation2 + $0x8] sm:$0xff]  ;;  %v151_v5 = vld [vmem:[#allocation7] sm:$0xff]  ;;  %vm191_vm1 = vcmask 261120   ;;  %s2113_s2 = smov 104   ;;  %s2114_s19 = smov 120  }
  0x81   :  { %1673 = vmatpush3.bf16.msra.mxu0 %v1846_v1  ;;  %v152_v6 = vld [vmem:[#allocation7 + $0x8] sm:$0xff]  ;;  %v153_v7 = vadd.f32 %v151_v5, %v2324_v3  ;;  %v1848_v9 = vld [vmem:[%s2588_s5] sm:$0xff]   ;;  %v1849_v10 = vld [vmem:[%s2588_s5 + $0x8] sm:$0xff]   ;;  %vm492_vm2 = vcmask 1043456   ;;  %vm488_vm3 = vcmask 64512   ;;  %vm674_vm4 = vcmask 130048  }
  0x82   :  { %1674 = vmatprep.subr.bf16.mxu0 %v2111_v0  ;;  %v154_v8 = vadd.f32 %v152_v6, %v2326_v4  ;;  %v147_v11 = vld [vmem:[#allocation5] sm:$0xff]  ;;  %v148_v12 = vld [vmem:[#allocation5 + $0x8] sm:$0xff]  ;;  %1680 = vmatprep.subr.bf16.mxu1 %v1848_v9  ;;  %v156_v14 = vld [vmem:[#allocation8] sm:$0xff] }
  0x83   :  { %v157_v15 = vld [vmem:[#allocation8 + $0x8] sm:$0xff]  ;;  %v166_v16 = vpack.c.bf16 %v148_v12, %v147_v11  ;;  %v149_v17 = vld [vmem:[#allocation5 + $0x10] sm:$0xff]  ;;  %1681 = vmatpush3.bf16.msra.mxu1 %v1848_v9  ;;  %v160_v18 = vadd.f32 %v156_v14, %v147_v11  ;;  %v158_v21 = vld [vmem:[#allocation8 + $0x10] sm:$0xff] }
  0x84   :  { %v155_v13 = vpack.c.bf16 %v154_v8, %v153_v7  ;;  %v161_v19 = vadd.f32 %v157_v15, %v148_v12  ;;  %v150_v20 = vld [vmem:[#allocation5 + $0x18] sm:$0xff]  ;;  %v159_v22 = vld [vmem:[#allocation8 + $0x18] sm:$0xff]  ;;  %1682 = vmatprep.subr.bf16.mxu1 %v1849_v10  ;;  %v162_v23 = vadd.f32 %v158_v21, %v149_v17  ;;  %v1590_v28 = vld [vmem:[%s2590_s7] ss:$0 sm:$0xff]  ;;  %s2115_s7 = smov 112  }
  0x85   :  { %1675 = vmatpush3.bf16.msra.mxu0 %v1847_v2  ;;  %v163_v24 = vadd.f32 %v159_v22, %v150_v20  ;;  %v167_v25 = vpack.c.bf16 %v150_v20, %v149_v17  ;;  %v1850_v32 = vld [vmem:[#allocation11] sm:$0xff]   ;;  %v1851_v33 = vld [vmem:[#allocation11 + $0x8] sm:$0xff]   ;;  %v1594_v43 = vld [vmem:[%s2591_s8] ss:$0 sm:$0xff] }
  0x86   :  { %v164_v26 = vpack.c.bf16 %v161_v19, %v160_v18  ;;  %1688 = vmatprep.subr.bf16.mxu0 %v1850_v32 }
  0x87   :  { %v165_v27 = vpack.c.bf16 %v163_v24, %v162_v23  ;;  %1683 = vmatpush3.bf16.msra.mxu1 %v1849_v10 }
  0x88   :  { %1677 = vmatmul.mubr.msk.bf16.vlgmr.msra.gmra.mrb[0].mxu0 %vm191_vm1, %v155_v13  ;;  %1684 = vmatprep.mubr.msk.bf16.mxu1 %vm191_vm1, %v164_v26 }
  0x89   :  { %1692 = vmatprep.mubr.msk.bf16.mxu0 %vm191_vm1, %v166_v16  ;;  %1696 = vmatprep.subr.bf16.mxu1 %v2111_v0 }
  0x8a   :  { %1685 = vmatmul.mubr.msk.bf16.vlgmr.msra.gmra.mrb[0].mxu1 %vm191_vm1, %v165_v27  ;;  %1689 = vmatpush3.bf16.msra.mxu0 %v1850_v32 }
  0x8b   :  { %1698 = vmatprep.mubr.msk.bf16.mxu1 %vm2112_vm0, %v2111_v0  ;;  %1690 = vmatprep.subr.bf16.mxu0 %v1851_v33 }
  0x8e   :  { %1691 = vmatpush3.bf16.msra.mxu0 %v1851_v33 }
  0x8f   :  { %1702 = vmatprep.subr.bf16.mxu0 %v2111_v0 }
  0x91   :  { %1693 = vmatmul.mubr.msk.bf16.vlgmr.msra.gmra.mrb[4].mxu0 %vm191_vm1, %v167_v25 }
  0x92   :  { %1704 = vmatprep.mubr.msk.bf16.mxu0 %vm2112_vm0, %v2111_v0 }
 0x15b   :  { %v229_v29 = vpop.f32.mrb[0].mxu0 }
 0x15c   :  { %v1678_v30 = vpop.f32.mrb[1].mxu0  ;;  %v230_v34 = vadd.f32 %v1590_v28, %v229_v29 }
 0x15d   :  { %v232_v31 = vpop.f32.mrb[2].mxu0  ;;  %v1686_v39 = vpop.f32.mrb[0].mxu1 }
 0x15e   :  { %v233_v35 = vadd.f32 %v1590_v28, %v232_v31  ;;  %v1679_v36 = vpop.f32.mrb[3].mxu0  ;;  %v299_v40 = vpop.f32.mrb[1].mxu1  ;;  %v308_v46 = vadd.f32 %v1686_v39, %v1594_v43 }
 0x15f   :  { %v1687_v41 = vpop.f32.mrb[2].mxu1  ;;  %v300_v44 = vadd.f32 %v1594_v43, %v299_v40 }
 0x160   :  { %v2347_v37 = vpack.c.bf16 %v233_v35, %v230_v34  ;;  %v1828_v38 = vpack.i.bf16 %v233_v35, %v230_v34  ;;  %v302_v42 = vpop.f32.mrb[3].mxu1  ;;  %v311_v47 = vadd.f32 %v1687_v41, %v1594_v43 }
 0x161   :  { %v303_v45 = vadd.f32 %v1594_v43, %v302_v42 }
 0x162   :  { %1829 = vrot.lane.b32.xlu1 %v1828_v38, %s2113_s2  ;;  %1819 = vrot.lane.b32.xlu0 %v1828_v38, %s2114_s19 }
 0x164   :  { %v2396_v11 = vpop.f32.mrb[4].mxu0 }
 0x165   :  { %v377_v12 = vpop.f32.mrb[5].mxu0 }
 0x166   :  { %1824 = vrot.lane.b32.xlu0 %v1828_v38, %s2115_s7  ;;  %v2398_v13 = vpop.f32.mrb[6].mxu0 }
 0x167   :  { %v380_v14 = vpop.f32.mrb[7].mxu0 }
 0x18b   :  { %416 = vxpose.xlu1.b32.start [1/4] (short) (narrow) %v300_v44, 32 }
 0x18f   :  { %417 = vxpose.xlu1.b32.cont [2/4] (short) (narrow) %v303_v45, 32 }
 0x193   :  { %418 = vxpose.xlu1.b32.cont [3/4] (short) (narrow) %v308_v46, 32 }
 0x197   :  { %419 = vxpose.xlu1.b32.end [4/4] (short) (narrow) %v311_v47, 32 }
 0x1d4   :  { %v1830_v48 = vpop.permute.xlu1 %1829  ;;  %v1820_v49 = vpop.permute.xlu0 %1819 }
 0x1d5   :  { %v1822_v54 = vunpack.i.h.bf16 %v1820_v49  ;;  %v1821_v55 = vunpack.i.l.bf16 %v1820_v49  ;;  %v1832_v5 = vunpack.i.h.bf16 %v1830_v48  ;;  %v1831_v6 = vunpack.i.l.bf16 %v1830_v48 }
 0x1d7   :  { %v2370_v60 = vpack.c.bf16 %v1822_v54, %v1821_v55  ;;  %v2389_v10 = vpack.c.bf16 %v1832_v5, %v1831_v6 }
 0x1d8   :  { %v1825_v57 = vpop.permute.xlu0 %1824 }
 0x1d9   :  { %v1827_v61 = vunpack.i.h.bf16 %v1825_v57  ;;  %v1826_v62 = vunpack.i.l.bf16 %v1825_v57 }
 0x1db   :  { %v2381_v7 = vpack.c.bf16 %v1827_v61, %v1826_v62 }
 0x20b   :  { %v432_v50 = vpop.trf.xlu1 }
 0x20c   :  { %v2357_v51 = vpack.c.bf16 %v432_v50, %v432_v50 }
 0x20e   :  { %v494_v52 = vsel %vm492_vm2, %v2357_v51, 0 }
 0x20f   :  { %1697 = vmatpush3.bf16.msra.mxu1 %v494_v52  ;;  %v433_v53 = vpop.trf.xlu1 }
 0x210   :  { %v2361_v56 = vpack.c.bf16 %v433_v53, %v433_v53  ;;  %1708 = vmatprep.subr.bf16.mxu1 %v2111_v0 }
 0x212   :  { %v540_v58 = vsel %vm492_vm2, %v2361_v56, 0  ;;  %1699 = vmatmul.mubr.msk.bf16.vlgmr.msra.gmra.mrb[4].mxu1 %vm488_vm3, %v2347_v37 }
 0x213   :  { %1703 = vmatpush3.bf16.msra.mxu0 %v540_v58  ;;  %v434_v59 = vpop.trf.xlu1  ;;  %1710 = vmatprep.mubr.msk.bf16.mxu1 %vm2112_vm0, %v2111_v0  ;;  %v1599_v58 = vld [vmem:[#allocation13] ss:$0 sm:$0xff] }
 0x214   :  { %v2372_v63 = vpack.c.bf16 %v434_v59, %v434_v59  ;;  %1714 = vmatprep.subr.bf16.mxu0 %v2111_v0  ;;  %v378_v59 = vadd.f32 %v1599_v58, %v377_v12  ;;  %v381_v61 = vadd.f32 %v1599_v58, %v380_v14 }
 0x216   :  { %v586_v1 = vsel %vm492_vm2, %v2372_v63, 0  ;;  %1705 = vmatmul.mubr.msk.bf16.vlgmr.msra.gmra.mrb[8].mxu0 %vm488_vm3, %v2370_v60 }
 0x217   :  { %v435_v2 = vpop.trf.xlu1  ;;  %1709 = vmatpush3.bf16.msra.mxu1 %v586_v1  ;;  %1716 = vmatprep.mubr.msk.bf16.mxu0 %vm2112_vm0, %v2111_v0 }
 0x218   :  { %v451_v8 = vpack.c.bf16 %v435_v2, %v435_v2  ;;  %1720 = vmatprep.subr.bf16.mxu1 %v2111_v0 }
 0x21a   :  { %v632_v9 = vsel %vm492_vm2, %v451_v8, 0  ;;  %1711 = vmatmul.mubr.msk.bf16.vlgmr.msra.gmra.mrb[8].mxu1 %vm488_vm3, %v2381_v7 }
 0x21b   :  { %1715 = vmatpush3.bf16.msra.mxu0 %v632_v9  ;;  %1722 = vmatprep.mubr.msk.bf16.mxu1 %vm2112_vm0, %v2111_v0 }
 0x21c   :  { %1726 = vmatprep.subr.bf16.mxu0 %v2111_v0 }
 0x21e   :  { %1717 = vmatmul.mubr.msk.bf16.vlgmr.msra.gmra.mrb[12].mxu0 %vm488_vm3, %v2389_v10 }
 0x21f   :  { %1728 = vmatprep.mubr.msk.bf16.mxu0 %vm2112_vm0, %v2111_v0 }
 0x2e5   :  { %v530_v15 = vpop.f32.mrb[4].mxu1 }
 0x2e6   :  { %v1700_v16 = vpop.f32.mrb[5].mxu1  ;;  %v675_v17 = vsel %vm674_vm4, %v530_v15, -inf }
 0x2e7   :  { %676 = vmax.xlane.f32.xlu0 %v675_v17  ;;  %v533_v18 = vpop.f32.mrb[6].mxu1 }
 0x2e8   :  { %v1701_v19 = vpop.f32.mrb[7].mxu1 }
 0x2e9   :  { %v576_v20 = vpop.f32.mrb[8].mxu0 }
 0x2ea   :  { %v1706_v21 = vpop.f32.mrb[9].mxu0  ;;  %v678_v22 = vsel %vm674_vm4, %v576_v20, -inf }
 0x2eb   :  { %679 = vmax.xlane.f32.xlu0 %v678_v22  ;;  %v579_v23 = vpop.f32.mrb[10].mxu0 }
 0x2ec   :  { %v1707_v24 = vpop.f32.mrb[11].mxu0 }
 0x2ed   :  { %v622_v25 = vpop.f32.mrb[8].mxu1 }
 0x2ee   :  { %v1712_v26 = vpop.f32.mrb[9].mxu1  ;;  %v681_v27 = vsel %vm674_vm4, %v622_v25, -inf }
 0x2ef   :  { %v625_v28 = vpop.f32.mrb[10].mxu1  ;;  %682 = vmax.xlane.f32.xlu0 %v681_v27 }
 0x2f0   :  { %v1713_v29 = vpop.f32.mrb[11].mxu1 }
 0x2f1   :  { %v668_v30 = vpop.f32.mrb[12].mxu0 }
 0x2f2   :  { %v1718_v31 = vpop.f32.mrb[13].mxu0  ;;  %v684_v32 = vsel %vm674_vm4, %v668_v30, -inf }
 0x2f3   :  { %685 = vmax.xlane.f32.xlu0 %v684_v32  ;;  %v671_v33 = vpop.f32.mrb[14].mxu0 }
 0x2f4   :  { %v1719_v34 = vpop.f32.mrb[15].mxu0 }
 0x374   :  { %v677_v35 = vpop.xlane.xlu0 %676 }
 0x375   :  { %v687_v36 = vsub.f32 %v530_v15, %v677_v35 }
 0x377   :  { %v691_v38 = vmul.f32 1.442695, %v687_v36 }
 0x378   :  { %v680_v39 = vpop.xlane.xlu0 %679 }
 0x379   :  { %1854 = vpow2.f32 %v691_v38  ;;  %v688_v40 = vsub.f32 %v576_v20, %v680_v39 }
 0x37b   :  { %v693_v41 = vmul.f32 1.442695, %v688_v40 }
 0x37c   :  { %v683_v42 = vpop.xlane.xlu0 %682 }
 0x37d   :  { %1856 = vpow2.f32 %v693_v41  ;;  %v689_v43 = vsub.f32 %v622_v25, %v683_v42 }
 0x37f   :  { %v695_v44 = vmul.f32 1.442695, %v689_v43 }
 0x380   :  { %v686_v52 = vpop.xlane.xlu0 %685 }
 0x381   :  { %1858 = vpow2.f32 %v695_v44  ;;  %v690_v53 = vsub.f32 %v668_v30, %v686_v52 }
 0x383   :  { %v1855_v45 = vpop.eup %1854  ;;  %v697_v54 = vmul.f32 1.442695, %v690_v53 }
 0x384   :  { %v699_v46 = vsel %vm674_vm4, %v1855_v45, 0.0 }
 0x385   :  { %700 = vadd.xlane.f32.xlu0 %v699_v46  ;;  %1860 = vpow2.f32 %v697_v54 }
 0x387   :  { %v1857_v47 = vpop.eup %1856 }
 0x388   :  { %v702_v48 = vsel %vm674_vm4, %v1857_v47, 0.0 }
 0x389   :  { %703 = vadd.xlane.f32.xlu0 %v702_v48  ;;  %v999_v48 = vrot.slane %v2370_v60, 4  ;;  %v1101_v60 = vrot.slane %v2389_v10, 4 }
 0x38b   :  { %v1859_v49 = vpop.eup %1858 }
 0x38c   :  { %v705_v50 = vsel %vm674_vm4, %v1859_v49, 0.0 }
 0x38d   :  { %706 = vadd.xlane.f32.xlu1 %v705_v50 }
 0x38f   :  { %v1861_v55 = vpop.eup %1860 }
 0x390   :  { %v708_v57 = vsel %vm674_vm4, %v1861_v55, 0.0 }
 0x39e   :  { %1103 = vrot.lane.b32.xlu1 %v451_v8, %s2115_s7 }
 0x39f   :  { %950 = vrot.lane.b32.xlu0 %v2357_v51, %s2115_s7  ;;  %v386_v51 = vadd.f32 %v2396_v11, %v1599_v58 }
 0x3a3   :  { %1001 = vrot.lane.b32.xlu0 %v2361_v56, %s2115_s7  ;;  %v389_v56 = vadd.f32 %v2398_v13, %v1599_v58 }
 0x3a7   :  { %1052 = vrot.lane.b32.xlu0 %v2372_v63, %s2115_s7 }
 0x3c6   :  { %709 = vadd.xlane.f32.xlu0 %v708_v57 }
 0x3f3   :  { %452 = vxpose.xlu0.b32.start [1/4] (short) (narrow) %v378_v59, 32 }
 0x3f7   :  { %453 = vxpose.xlu0.b32.cont [2/4] (short) (narrow) %v381_v61, 32 }
 0x3fb   :  { %454 = vxpose.xlu0.b32.cont [3/4] (short) (narrow) %v386_v51, 32 }
 0x3ff   :  { %455 = vxpose.xlu0.b32.end [4/4] (short) (narrow) %v389_v56, 32 }
 0x412   :  { %v701_v62 = vpop.xlane.xlu0 %700 }
 0x413   :  { %1862 = vrcp.f32 %v701_v62 }
 0x416   :  { %v704_v63 = vpop.xlane.xlu0 %703 }
 0x417   :  { %1864 = vrcp.f32 %v704_v63 }
 0x41a   :  { %v951_v13 = vpop.permute.xlu0 %950  ;;  %v707_v14 = vpop.xlane.xlu1 %706 }
 0x41b   :  { %1866 = vrcp.f32 %v707_v14  ;;  %v956_v41 = vsel %vm492_vm2, %v951_v13, 0 }
 0x41d   :  { %v1863_v1 = vpop.eup %1862 }
 0x41e   :  { %v715_v2 = vmul.f32 %v1863_v1, %v1855_v45  ;;  %v1002_v15 = vpop.permute.xlu0 %1001  ;;  %v948_v45 = vrot.slane %v2347_v37, 4  ;;  %v1050_v37 = vrot.slane %v2381_v7, 4 }
 0x41f   :  { %v1007_v44 = vsel %vm492_vm2, %v1002_v15, 0 }
 0x420   :  { %v727_v5 = vpack.c.bf16 %v715_v2, %v715_v2  ;;  %v719_v21 = vsel %vm674_vm4, %v715_v2, 0.0 }
 0x421   :  { %v1865_v6 = vpop.eup %1864 }
 0x422   :  { %v735_v8 = vsel %vm674_vm4, %v727_v5, 0  ;;  %v716_v9 = vmul.f32 %v1865_v6, %v1857_v47  ;;  %v1053_v16 = vpop.permute.xlu0 %1052  ;;  %v1104_v47 = vpop.permute.xlu1 %1103 }
 0x423   :  { %1721 = vmatpush3.bf16.xpose.msra.mxu1 %v735_v8  ;;  %v1058_v46 = vsel %vm492_vm2, %v1053_v16, 0 }
 0x424   :  { %v728_v12 = vpack.c.bf16 %v716_v9, %v716_v9  ;;  %1732 = vmatprep.subr.bf16.mxu1 %v2111_v0  ;;  %v720_v20 = vsel %vm674_vm4, %v716_v9, 0.0 }
 0x425   :  { %v1867_v18 = vpop.eup %1866  ;;  %v721_v24 = vadd.f32 %v720_v20, %v719_v21 }
 0x426   :  { %v781_v11 = vsel %vm674_vm4, %v728_v12, 0  ;;  %v717_v19 = vmul.f32 %v1867_v18, %v1859_v49  ;;  %v1109_v49 = vsel %vm492_vm2, %v1104_v47, 0 }
 0x427   :  { %1727 = vmatpush3.bf16.xpose.msra.mxu0 %v781_v11 }
 0x428   :  { %1738 = vmatprep.subr.bf16.mxu0 %v2111_v0  ;;  %v722_v22 = vsel %vm674_vm4, %v717_v19, 0.0  ;;  %v729_v30 = vpack.c.bf16 %v717_v19, %v717_v19 }
 0x429   :  { %v723_v26 = vadd.f32 %v722_v22, %v721_v24 }
 0x42a   :  { %v827_v33 = vsel %vm674_vm4, %v729_v30, 0 }
 0x453   :  { %v710_v17 = vpop.xlane.xlu0 %709 }
 0x454   :  { %1868 = vrcp.f32 %v710_v17 }
 0x45e   :  { %v1869_v23 = vpop.eup %1868 }
 0x45f   :  { %v718_v25 = vmul.f32 %v1869_v23, %v1861_v55 }
 0x461   :  { %v724_v27 = vsel %vm674_vm4, %v718_v25, 0.0  ;;  %v730_v34 = vpack.c.bf16 %v718_v25, %v718_v25 }
 0x462   :  { %v725_v28 = vadd.f32 %v724_v27, %v723_v26 }
 0x463   :  { %v873_v38 = vsel %vm674_vm4, %v730_v34, 0 }
 0x464   :  { %v726_v29 = vmul.f32 0.25, %v725_v28 }
 0x466   :  { %1552 = vst.msk [vmem:[#allocation15] sm:$0xff] %vm674_vm4, %v726_v29 }
 0x473   :  { %v468_v31 = vpop.trf.xlu0 }
 0x474   :  { %v2426_v32 = vpack.c.bf16 %v468_v31, %v468_v31 }
 0x476   :  { %1723 = vmatmul.mubr.msk.bf16.vlgmr.msra.gmra.mrb[12].mxu1 %vm674_vm4, %v2426_v32 }
 0x477   :  { %1733 = vmatpush3.bf16.xpose.msra.mxu1 %v827_v33  ;;  %v469_v35 = vpop.trf.xlu0  ;;  %1734 = vmatprep.mubr.msk.bf16.mxu1 %vm2112_vm0, %v2111_v0 }
 0x478   :  { %v2433_v36 = vpack.c.bf16 %v469_v35, %v469_v35  ;;  %1744 = vmatprep.subr.bf16.mxu1 %v2111_v0 }
 0x47a   :  { %1729 = vmatmul.mubr.msk.bf16.vlgmr.msra.gmra.mrb[16].mxu0 %vm674_vm4, %v2433_v36 }
 0x47b   :  { %1739 = vmatpush3.bf16.xpose.msra.mxu0 %v873_v38  ;;  %v470_v39 = vpop.trf.xlu0  ;;  %1740 = vmatprep.mubr.msk.bf16.mxu0 %vm2112_vm0, %v2111_v0 }
 0x47c   :  { %v2441_v40 = vpack.c.bf16 %v470_v39, %v470_v39  ;;  %1750 = vmatprep.subr.bf16.mxu0 %v2111_v0 }
 0x47e   :  { %1735 = vmatmul.mubr.msk.bf16.vlgmr.msra.gmra.mrb[16].mxu1 %vm674_vm4, %v2441_v40 }
 0x47f   :  { %1745 = vmatpush3.bf16.msra.mxu1 %v956_v41  ;;  %v471_v42 = vpop.trf.xlu0  ;;  %1746 = vmatprep.mubr.msk.bf16.mxu1 %vm2112_vm0, %v2111_v0 }
 0x480   :  { %v2449_v43 = vpack.c.bf16 %v471_v42, %v471_v42  ;;  %1756 = vmatprep.subr.bf16.mxu1 %v2111_v0 }
 0x482   :  { %1741 = vmatmul.mubr.msk.bf16.vlgmr.msra.gmra.mrb[20].mxu0 %vm674_vm4, %v2449_v43 }
 0x483   :  { %1751 = vmatpush3.bf16.msra.mxu0 %v1007_v44  ;;  %1752 = vmatprep.mubr.msk.bf16.mxu0 %vm2112_vm0, %v2111_v0 }
 0x484   :  { %1762 = vmatprep.subr.bf16.mxu0 %v2111_v0 }
 0x486   :  { %1747 = vmatmul.mubr.msk.bf16.vlgmr.msra.gmra.mrb[20].mxu1 %vm488_vm3, %v948_v45 }
 0x487   :  { %1757 = vmatpush3.bf16.msra.mxu1 %v1058_v46  ;;  %1758 = vmatprep.mubr.msk.bf16.mxu1 %vm2112_vm0, %v2111_v0 }
 0x488   :  { %1768 = vmatprep.subr.bf16.mxu1 %v2111_v0 }
 0x48a   :  { %1753 = vmatmul.mubr.msk.bf16.vlgmr.msra.gmra.mrb[24].mxu0 %vm488_vm3, %v999_v48 }
 0x48b   :  { %1763 = vmatpush3.bf16.msra.mxu0 %v1109_v49  ;;  %1764 = vmatprep.mubr.msk.bf16.mxu0 %vm2112_vm0, %v2111_v0 }
 0x48c   :  { %1774 = vmatprep.subr.bf16.mxu0 %v2111_v0 }
 0x48e   :  { %1759 = vmatmul.mubr.msk.bf16.vlgmr.msra.gmra.mrb[24].mxu1 %vm488_vm3, %v1050_v37 }
 0x48f   :  { %1770 = vmatprep.mubr.msk.bf16.mxu1 %vm2112_vm0, %v2111_v0 }
 0x492   :  { %1765 = vmatmul.mubr.msk.bf16.vlgmr.msra.gmra.mrb[28].mxu0 %vm488_vm3, %v1101_v60 }
 0x493   :  { %1776 = vmatprep.mubr.msk.bf16.mxu0 %vm2112_vm0, %v2111_v0 }
 0x549   :  { %v2478_v50 = vpop.f32.mrb[12].mxu1 }
 0x54a   :  { %v1724_v52 = vpop.f32.mrb[13].mxu1 }
 0x54b   :  { %v774_v53 = vpop.f32.mrb[14].mxu1 }
 0x54c   :  { %v1725_v54 = vpop.f32.mrb[15].mxu1 }
 0x54d   :  { %v2480_v7 = vpop.f32.mrb[16].mxu0 }
 0x54e   :  { %v1730_v55 = vpop.f32.mrb[17].mxu0 }
 0x54f   :  { %v820_v57 = vpop.f32.mrb[18].mxu0 }
 0x550   :  { %v1731_v58 = vpop.f32.mrb[19].mxu0 }
 0x551   :  { %v2482_v59 = vpop.f32.mrb[16].mxu1 }
 0x552   :  { %v1736_v61 = vpop.f32.mrb[17].mxu1 }
 0x553   :  { %v866_v51 = vpop.f32.mrb[18].mxu1 }
 0x554   :  { %v1737_v10 = vpop.f32.mrb[19].mxu1 }
 0x555   :  { %v2484_v56 = vpop.f32.mrb[20].mxu0 }
 0x556   :  { %v1742_v62 = vpop.f32.mrb[21].mxu0 }
 0x557   :  { %v912_v63 = vpop.f32.mrb[22].mxu0 }
 0x558   :  { %v1743_v1 = vpop.f32.mrb[23].mxu0 }
 0x559   :  { %v992_v2 = vpop.f32.mrb[20].mxu1 }
 0x55a   :  { %v1748_v5 = vpop.f32.mrb[21].mxu1  ;;  %v1151_v6 = vsel %vm674_vm4, %v992_v2, -inf }
 0x55b   :  { %1152 = vmax.xlane.f32.xlu1 %v1151_v6  ;;  %v995_v8 = vpop.f32.mrb[22].mxu1 }
 0x55c   :  { %v1749_v9 = vpop.f32.mrb[23].mxu1 }
 0x55d   :  { %v1043_v12 = vpop.f32.mrb[24].mxu0 }
 0x55e   :  { %v1754_v11 = vpop.f32.mrb[25].mxu0  ;;  %v1154_v13 = vsel %vm674_vm4, %v1043_v12, -inf }
 0x55f   :  { %1155 = vmax.xlane.f32.xlu0 %v1154_v13  ;;  %v1046_v14 = vpop.f32.mrb[26].mxu0 }
 0x560   :  { %v1755_v15 = vpop.f32.mrb[27].mxu0 }
 0x561   :  { %v1094_v16 = vpop.f32.mrb[24].mxu1 }
 0x562   :  { %v1760_v17 = vpop.f32.mrb[25].mxu1  ;;  %v1157_v18 = vsel %vm674_vm4, %v1094_v16, -inf }
 0x563   :  { %1158 = vmax.xlane.f32.xlu1 %v1157_v18  ;;  %v1097_v19 = vpop.f32.mrb[26].mxu1 }
 0x564   :  { %v1761_v20 = vpop.f32.mrb[27].mxu1 }
 0x565   :  { %v1145_v21 = vpop.f32.mrb[28].mxu0 }
 0x566   :  { %v1766_v22 = vpop.f32.mrb[29].mxu0  ;;  %v1160_v23 = vsel %vm674_vm4, %v1145_v21, -inf }
 0x567   :  { %1161 = vmax.xlane.f32.xlu1 %v1160_v23  ;;  %v1148_v24 = vpop.f32.mrb[30].mxu0 }
 0x568   :  { %v1767_v25 = vpop.f32.mrb[31].mxu0 }
 0x575   :  { %1257 = vrot.lane.b32.xlu0 %v2433_v36, %s2115_s7 }
 0x578   :  { %1208 = vrot.lane.b32.xlu1 %v2426_v32, %s2115_s7 }
 0x5e8   :  { %v1153_v26 = vpop.xlane.xlu1 %1152 }
 0x5e9   :  { %v1163_v27 = vsub.f32 %v992_v2, %v1153_v26 }
 0x5eb   :  { %v1167_v28 = vmul.f32 1.442695, %v1163_v27 }
 0x5ec   :  { %v1156_v29 = vpop.xlane.xlu0 %1155 }
 0x5ed   :  { %1870 = vpow2.f32 %v1167_v28  ;;  %v1164_v30 = vsub.f32 %v1043_v12, %v1156_v29  ;;  %v1853_v28 = vld [vmem:[%s2593_s10 + $0x8] sm:$0xff]  }
 0x5ef   :  { %v1169_v31 = vmul.f32 1.442695, %v1164_v30 }
 0x5f0   :  { %v1159_v33 = vpop.xlane.xlu1 %1158  ;;  %v1258_v15 = vpop.permute.xlu0 %1257 }
 0x5f1   :  { %1872 = vpow2.f32 %v1169_v31  ;;  %v1165_v34 = vsub.f32 %v1094_v16, %v1159_v33 }
 0x5f3   :  { %v1171_v35 = vmul.f32 1.442695, %v1165_v34 }
 0x5f4   :  { %v1162_v38 = vpop.xlane.xlu1 %1161 }
 0x5f5   :  { %1874 = vpow2.f32 %v1171_v35  ;;  %v1166_v39 = vsub.f32 %v1145_v21, %v1162_v38  ;;  %v1852_v21 = vld [vmem:[%s2593_s10] sm:$0xff]  }
 0x5f7   :  { %v1871_v41 = vpop.eup %1870  ;;  %v1173_v42 = vmul.f32 1.442695, %v1166_v39 }
 0x5f8   :  { %v1175_v36 = vsel %vm674_vm4, %v1871_v41, 0.0  ;;  %v1209_v49 = vpop.permute.xlu1 %1208 }
 0x5f9   :  { %1876 = vpow2.f32 %v1173_v42  ;;  %1176 = vadd.xlane.f32.xlu1 %v1175_v36 }
 0x5fb   :  { %v1873_v32 = vpop.eup %1872 }
 0x5fc   :  { %v1178_v44 = vsel %vm674_vm4, %v1873_v32, 0.0 }
 0x5fd   :  { %1179 = vadd.xlane.f32.xlu1 %v1178_v44 }
 0x5ff   :  { %v1875_v45 = vpop.eup %1874 }
 0x600   :  { %v1181_v46 = vsel %vm674_vm4, %v1875_v45, 0.0 }
 0x601   :  { %1182 = vadd.xlane.f32.xlu1 %v1181_v46 }
 0x603   :  { %v1877_v47 = vpop.eup %1876 }
 0x604   :  { %v1184_v48 = vsel %vm674_vm4, %v1877_v47, 0.0 }
 0x605   :  { %1185 = vadd.xlane.f32.xlu1 %v1184_v48 }
 0x616   :  { %1306 = vrot.lane.b32.xlu1 %v2441_v40, %s2115_s7 }
 0x61a   :  { %1355 = vrot.lane.b32.xlu1 %v2449_v43, %s2115_s7 }
 0x686   :  { %v1177_v37 = vpop.xlane.xlu1 %1176 }
 0x687   :  { %1878 = vrcp.f32 %v1177_v37 }
 0x68a   :  { %v1180_v60 = vpop.xlane.xlu1 %1179 }
 0x68b   :  { %1880 = vrcp.f32 %v1180_v60 }
 0x68e   :  { %v1183_v52 = vpop.xlane.xlu1 %1182 }
 0x68f   :  { %1882 = vrcp.f32 %v1183_v52 }
 0x691   :  { %v1879_v53 = vpop.eup %1878 }
 0x692   :  { %v1186_v54 = vpop.xlane.xlu1 %1185  ;;  %v1191_v55 = vmul.f32 %v1879_v53, %v1871_v41 }
 0x693   :  { %1884 = vrcp.f32 %v1186_v54 }
 0x694   :  { %v1203_v57 = vpack.c.bf16 %v1191_v55, %v1191_v55  ;;  %v1195_v1 = vsel %vm674_vm4, %v1191_v55, 0.0 }
 0x695   :  { %v1881_v58 = vpop.eup %1880 }
 0x696   :  { %v1214_v61 = vsel %vm674_vm4, %v1203_v57, 0  ;;  %v1192_v51 = vmul.f32 %v1881_v58, %v1873_v32  ;;  %v1307_v18 = vpop.permute.xlu1 %1306 }
 0x697   :  { %1769 = vmatpush3.bf16.xpose.msra.mxu1 %v1214_v61 }
 0x698   :  { %v1204_v40 = vpack.c.bf16 %v1192_v51, %v1192_v51  ;;  %1780 = vmatprep.subr.bf16.mxu1 %v2111_v0  ;;  %v1196_v10 = vsel %vm674_vm4, %v1192_v51, 0.0 }
 0x699   :  { %v1883_v43 = vpop.eup %1882  ;;  %v1197_v8 = vadd.f32 %v1196_v10, %v1195_v1 }
 0x69a   :  { %v1263_v62 = vsel %vm674_vm4, %v1204_v40, 0  ;;  %v1193_v63 = vmul.f32 %v1883_v43, %v1875_v45  ;;  %v1356_v20 = vpop.permute.xlu1 %1355 }
 0x69b   :  { %1775 = vmatpush3.bf16.xpose.msra.mxu0 %v1263_v62 }
 0x69c   :  { %v1198_v2 = vsel %vm674_vm4, %v1193_v63, 0.0  ;;  %v1205_v5 = vpack.c.bf16 %v1193_v63, %v1193_v63  ;;  %1786 = vmatprep.subr.bf16.mxu0 %v2111_v0 }
 0x69d   :  { %v1885_v6 = vpop.eup %1884  ;;  %v1199_v11 = vadd.f32 %v1198_v2, %v1197_v8 }
 0x69e   :  { %1771 = vmatmul.mubr.msk.bf16.vlgmr.msra.gmra.mrb[28].mxu1 %vm674_vm4, %v1209_v49  ;;  %v1312_v9 = vsel %vm674_vm4, %v1205_v5, 0  ;;  %v1194_v12 = vmul.f32 %v1885_v6, %v1877_v47 }
 0x69f   :  { %1781 = vmatpush3.bf16.xpose.msra.mxu1 %v1312_v9  ;;  %1782 = vmatprep.mubr.msk.bf16.mxu1 %vm2112_vm0, %v2111_v0 }
 0x6a0   :  { %v1206_v13 = vpack.c.bf16 %v1194_v12, %v1194_v12  ;;  %1792 = vmatprep.subr.bf16.mxu1 %v2111_v0  ;;  %v1200_v14 = vsel %vm674_vm4, %v1194_v12, 0.0 }
 0x6a1   :  { %v1201_v16 = vadd.f32 %v1200_v14, %v1199_v11 }
 0x6a2   :  { %1777 = vmatmul.mubr.msk.bf16.vlgmr.msra.gmra.mrb[32].mxu0 %vm674_vm4, %v1258_v15  ;;  %v1361_v17 = vsel %vm674_vm4, %v1206_v13, 0 }
 0x6a3   :  { %1787 = vmatpush3.bf16.xpose.msra.mxu0 %v1361_v17  ;;  %1788 = vmatprep.mubr.msk.bf16.mxu0 %vm2112_vm0, %v2111_v0  ;;  %v1202_v19 = vmul.f32 0.25, %v1201_v16 }
 0x6a5   :  { %1553 = vst.msk [vmem:[#allocation15 + $0x8] sm:$0xff] %vm674_vm4, %v1202_v19 }
 0x6a6   :  { %1783 = vmatmul.mubr.msk.bf16.vlgmr.msra.gmra.mrb[32].mxu1 %vm674_vm4, %v1307_v18 }
 0x6a7   :  { %1796 = vmatprep.mubr.msk.bf16.mxu1 %vm2112_vm0, %v2111_v0  ;;  %1793 = vmatpush3.bf16.msra.mxu1 %v1852_v21 }
 0x6a8   :  { %1794 = vmatprep.subr.bf16.mxu1 %v2111_v0 }
 0x6aa   :  { %1789 = vmatmul.mubr.msk.bf16.vlgmr.msra.gmra.mrb[36].mxu0 %vm674_vm4, %v1356_v20 }
 0x6ab   :  { %1795 = vmatpush3.bf16.msra.mxu1 %v1853_v28 }
 0x771   :  { %v1250_v22 = vpop.f32.mrb[28].mxu1 }
 0x772   :  { %v1833_v23 = vpack.i.bf16 %v1250_v22, %v2478_v50  ;;  %v1772_v24 = vpop.f32.mrb[29].mxu1 }
 0x773   :  { %v1253_v25 = vpop.f32.mrb[30].mxu1 }
 0x774   :  { %1834 = vxpose.xlu1.b32.start [1/4] (short) (narrow) %v1833_v23, 8  ;;  %v1773_v26 = vpop.f32.mrb[31].mxu1 }
 0x775   :  { %v1299_v27 = vpop.f32.mrb[32].mxu0 }
 0x776   :  { %v1835_v29 = vpack.i.bf16 %v1299_v27, %v2480_v7  ;;  %v1778_v30 = vpop.f32.mrb[33].mxu0 }
 0x777   :  { %v1302_v31 = vpop.f32.mrb[34].mxu0 }
 0x778   :  { %1836 = vxpose.xlu1.b32.cont [2/4] (short) (narrow) %v1835_v29, 8  ;;  %v1779_v33 = vpop.f32.mrb[35].mxu0 }
 0x779   :  { %v1348_v0 = vpop.f32.mrb[32].mxu1 }
 0x77a   :  { %v1837_v34 = vpack.i.bf16 %v1348_v0, %v2482_v59  ;;  %v1784_v50 = vpop.f32.mrb[33].mxu1  ;;  %v1620_v59 = vld [vmem:[%s2594_s11] ss:$0 sm:$0xff]  ;;  %s2116_s11 = smov [#allocation15]  }
 0x77b   :  { %v1351_v35 = vpop.f32.mrb[34].mxu1  ;;  %s1571_s3 = sshll.u32 %s2116_s11, 4  ;;  %s1572_s3 = int_to_ptr.vmem [resolvable:$true] %s1571_s3 }
 0x77c   :  { %v1785_v38 = vpop.f32.mrb[35].mxu1  ;;  %1838 = vxpose.xlu1.b32.cont [3/4] (short) (narrow) %v1837_v34, 8  ;;  %s2044_s29 = scalar_lea.vmem %s1572_s3, 256  ;;  %p2049_p1 = scmp.lt.s32.totalorder %s1572_s3, %s1572_s3 }
 0x77d   :  { %v1397_v39 = vpop.f32.mrb[36].mxu0  ;;  %p2045_p0 = scmp.ne.s32.totalorder %s1572_s3, %s2044_s29  ;;  %p2050_p2 = scmp.lt.s32.totalorder %s2044_s29, %s2044_s29 }
 0x77e   :  { %v1839_v41 = vpack.i.bf16 %v1397_v39, %v2484_v56  ;;  %v1790_v42 = vpop.f32.mrb[37].mxu0 }
 0x77f   :  { %v1400_v36 = vpop.f32.mrb[38].mxu0  ;;  %p2051_p3 = por %p2050_p2, %p2049_p1 }
 0x780   :  { %1840 = vxpose.xlu1.b32.end [4/4] (short) (narrow) %v1839_v41, 8  ;;  %v1791_v32 = vpop.f32.mrb[39].mxu0 }
 0x781   :  { %p2052_p4 = pnand %p2051_p3, %p2045_p0 }
 0x7f4   :  { %v1841_v7 = vpop.trf.xlu1 }
 0x7f5   :  { %v1845_v44 = vunpack.i.h.bf16 %v1841_v7  ;;  %v1842_v45 = vunpack.i.l.bf16 %v1841_v7 }
 0x7f7   :  { %v1435_v46 = vpack.c.bf16 %v1845_v44, %v1842_v45 }
 0x7f9   :  { %1797 = vmatmul.mubr.msk.bf16.vlgmr.msra.gmra.mrb[36].mxu1 %vm191_vm1, %v1435_v46 }
 0x8cc   :  { %v1496_v47 = vpop.f32.mrb[36].mxu1 }
 0x8cd   :  { %v1497_v48 = vadd.f32 %v1620_v59, %v1496_v47  ;;  %v1798_v49 = vpop.f32.mrb[37].mxu1 }
 0x8ce   :  { %v1499_v37 = vpop.f32.mrb[38].mxu1 }
 0x8cf   :  { %v1500_v60 = vadd.f32 %v1620_v59, %v1499_v37  ;;  %v1799_v56 = vpop.f32.mrb[39].mxu1  ;;  %v1503_v52 = vadd.f32 %v1497_v48, %v2324_v3 }
 0x8d1   :  { %v1505_v53 = vsel %vm191_vm1, %v1503_v52, 0.0  ;;  %v1504_v54 = vadd.f32 %v1500_v60, %v2326_v4 }
 0x8d2   :  { %1506 = vadd.xlane.f32.xlu0 %v1505_v53 }
 0x8d3   :  { %v1508_v55 = vsel %vm191_vm1, %v1504_v54, 0.0 }
 0x8d6   :  { %1509 = vadd.xlane.f32.xlu0 %v1508_v55 }
 0x95f   :  { %v1507_v57 = vpop.xlane.xlu0 %1506 }
 0x960   :  { %v1512_v58 = vmul.f32 0.03125, %v1507_v57 }
 0x962   :  { %v1514_v61 = vsub.f32 %v1503_v52, %v1512_v58 }
 0x963   :  { %v1510_v51 = vpop.xlane.xlu0 %1509 }
 0x964   :  { %v1513_v40 = vmul.f32 0.03125, %v1510_v51  ;;  %v1516_v43 = vmul.f32 %v1514_v61, %v1514_v61 }
 0x966   :  { %v1515_v10 = vsub.f32 %v1504_v54, %v1513_v40  ;;  %v1518_v62 = vsel %vm191_vm1, %v1516_v43, 0.0 }
 0x967   :  { %1519 = vadd.xlane.f32.xlu0 %v1518_v62 }
 0x968   :  { %v1517_v63 = vmul.f32 %v1515_v10, %v1515_v10 }
 0x96a   :  { %v1521_v3 = vsel %vm191_vm1, %v1517_v63, 0.0 }
 0x96b   :  { %1522 = vadd.xlane.f32.xlu0 %v1521_v3 }
 0x96c   :  { %2055 = shalt.err (!%p2052_p4)
}
 0x96d   :  { %s2056_s4 = scalar_lea.hbm %s2598_s15, 256 }
 0x96e   :  { %p2057_p5 = scmp.ne.s32.totalorder %s2598_s15, %s2056_s4  ;;  %p2060_p6 = scmp.lt.u32.totalorder %s2056_s4, %s2598_s15 }
 0x970   :  { %p2062_p7 = pnand %p2060_p6, %p2057_p5 }
 0x972   :  { %2065 = shalt.err (!%p2062_p7)
}
 0x973   :  { %1577 = dma.vmem_to_hbm [thread:$0]  %s1572_s3, 256, %s2598_s15, [#allocation16], %s2102_s30, %s2102_s30, %s2103_s16  }
 0x974   :  { %v1624_v12 = vld [vmem:[%s2595_s12] ss:$0 sm:$0xff]  ;;  %s2117_s15 = smov [#allocation14]  }
 0x975   :  { %v1625_v13 = vld [vmem:[%s2596_s13] ss:$0 sm:$0xff]  ;;  %s1559_s7 = sshll.u32 %s2117_s15, 4  ;;  %s1560_s7 = int_to_ptr.vmem [resolvable:$true] %s1559_s7 }
 0x976   :  { %s2066_s27 = scalar_lea.vmem %s1560_s7, 256  ;;  %p2071_p9 = scmp.lt.s32.totalorder %s1560_s7, %s1560_s7 }
 0x977   :  { %p2067_p8 = scmp.ne.s32.totalorder %s1560_s7, %s2066_s27  ;;  %p2072_p10 = scmp.lt.s32.totalorder %s2066_s27, %s2066_s27 }
 0x979   :  { %p2073_p11 = por %p2072_p10, %p2071_p9 }
 0x97b   :  { %p2074_p12 = pnand %p2073_p11, %p2067_p8 }
 0x9f4   :  { %v1520_v4 = vpop.xlane.xlu0 %1519 }
 0x9f5   :  { %v1524_v1 = vmul.f32 0.03125, %v1520_v4 }
 0x9f7   :  { %v1526_v2 = vadd.f32 1e-05, %v1524_v1 }
 0x9f8   :  { %v1523_v5 = vpop.xlane.xlu0 %1522 }
 0x9f9   :  { %1886 = vrsqrt.f32 %v1526_v2  ;;  %v1525_v6 = vmul.f32 0.03125, %v1523_v5 }
 0x9fb   :  { %v1527_v8 = vadd.f32 1e-05, %v1525_v6 }
 0x9fd   :  { %1888 = vrsqrt.f32 %v1527_v8 }
 0xa03   :  { %v1887_v9 = vpop.eup %1886 }
 0xa04   :  { %v1530_v11 = vmul.f32 %v1887_v9, %v1514_v61 }
 0xa06   :  { %v1539_v14 = vmul.f32 %v1624_v12, %v1530_v11 }
 0xa07   :  { %v1889_v15 = vpop.eup %1888 }
 0xa08   :  { %v1531_v16 = vmul.f32 %v1889_v15, %v1515_v10  ;;  %v1548_v17 = vadd.f32 %v1625_v13, %v1539_v14 }
 0xa0a   :  { %v1540_v18 = vmul.f32 %v1624_v12, %v1531_v16  ;;  %1550 = vst.msk [vmem:[#allocation14] sm:$0xff] %vm191_vm1, %v1548_v17 }
 0xa0c   :  { %v1549_v19 = vadd.f32 %v1625_v13, %v1540_v18 }
 0xa0e   :  { %1551 = vst.msk [vmem:[#allocation14 + $0x8] sm:$0xff] %vm191_vm1, %v1549_v19 }
 0xa0f   :  { %2077 = shalt.err (!%p2074_p12)
}
 0xa10   :  { %s2078_s28 = scalar_lea.hbm %s2597_s14, 256 }
 0xa11   :  { %p2079_p13 = scmp.ne.s32.totalorder %s2597_s14, %s2078_s28  ;;  %p2082_p0 = scmp.lt.u32.totalorder %s2078_s28, %s2597_s14 }
 0xa13   :  { %p2084_p1 = pnand %p2082_p0, %p2079_p13 }
 0xa15   :  { %2087 = shalt.err (!%p2084_p1)
}
 0xa16   :  { %1565 = dma.vmem_to_hbm [thread:$0]  %s1560_s7, 256, %s2597_s14, [#allocation4], %s2102_s30, %s2102_s30, %s2103_s16  }
 0xa17   :  { %2096 = dma.done.wait [#allocation4], 256  }
 0xa18   :  { %2097 = vsyncadd [#allocation4], 4294967040 }
 0xa19   :  { %2098 = dma.done.wait [#allocation16], 256  }
 0xa1a   :  { %2099 = vsyncadd [#allocation16], 4294967040 }
 0xa1b   :  { %1584 = vsyncpa [#allocation3], 1 }
 0xa1c   :  { %1585 = vsyncpa [#allocation6], 1 }
 0xa1d   :  { %1586 = vsyncpa [#allocation9], 1 }
 0xa1e   :  { %1587 = vsyncpa [#allocation12], 1 }
 0xa1f   :  { %1588 = vsyncpa [#allocation4], 1 }
 0xa20   :  { %1589 = vsyncpa [#allocation16], 1 }

</bundles_post_ra>
